<compile_context>
chip_gen: v7x
topology: tpu7x:2x2x1
jax: 0.10.0
libtpu: 0.0.40
codegen_flags: <defaults>
</compile_context>

<pallas_src>
from functools import partial

import numpy as np

import jax
import jax.numpy as jnp
from jax import lax
from jax.experimental import pallas as pl
from jax.experimental.pallas import tpu as pltpu

EPS = 1e-5        # PyTorch BatchNorm default
OUT_PAD = 128     # lane-dense width for the final (cout=1) layer
KSIZE = 3         # conv kernel size


# ----------------------------- Pallas kernel ------------------------------- #

def _cnn_kernel(cols1_ref, w1_ref, wcat_ref, wsmall_ref, p_ref, wexp_ref,
                o_ref, cols2_s, flat_s, *, n, np2, kk, c1, c2, l1, l2):
    """Whole CNN forward in one kernel; all intermediates stay in VMEM."""
    r2 = n * np2                  # conv2 / fc rows, ordered (spatial, sample)

    def mm(a, b):
        # Operands are already bf16; single MXU pass with f32 accumulation.
        return jnp.dot(a, b, preferred_element_type=jnp.float32)

    def bias_relu_bn(y, prow, relu=True, row_w=None):
        # p_ref rows prow..prow+2 hold (bias, gamma, beta) for this layer.
        w = y.shape[1]
        y = y + p_ref[prow:prow + 1, :w]
        if relu:
            y = jnp.maximum(y, 0.0)
        if row_w is None:
            mean = jnp.mean(y, axis=0, keepdims=True)
            yc = y - mean
            var = jnp.mean(yc * yc, axis=0, keepdims=True)
        else:                     # weighted stats over duplicated/padded rows
            mean = jnp.sum(y * row_w, axis=0, keepdims=True)
            yc = y - mean
            var = jnp.sum(yc * yc * row_w, axis=0, keepdims=True)
        return (yc * lax.rsqrt(var + EPS) * p_ref[prow + 1:prow + 2, :w]
                + p_ref[prow + 2:prow + 3, :w])

    # ---- conv1 on the expanded im2col + ReLU + BN2d (weighted stats) -------
    y1 = bias_relu_bn(mm(cols1_ref[...], w1_ref[...]), 0, row_w=wexp_ref[...])
    y1 = y1.astype(jnp.bfloat16)                      # (kk*r2 [+pad], c1)

    # ---- conv2: 9 static row-block -> lane-block copies, then ONE matmul ---
    for k in range(kk):
        cols2_s[:, k * c1:(k + 1) * c1] = y1[k * r2:(k + 1) * r2, :]
    y2 = bias_relu_bn(mm(cols2_s[...], wcat_ref[0:kk * c1, :]), 3)
    y2 = y2.astype(jnp.bfloat16)                      # (r2, c2)

    # ---- flatten (NCHW order folded into wfc1) + fc1 + ReLU + BN1d ---------
    for p in range(np2):
        flat_s[:, p * c2:(p + 1) * c2] = y2[p * n:(p + 1) * n, :]
    h = bias_relu_bn(
        mm(flat_s[...], wcat_ref[kk * c1:kk * c1 + np2 * c2, :]), 6)

    # ---- fc2 + BN1d (no ReLU) ----------------------------------------------
    h = bias_relu_bn(mm(h.astype(jnp.bfloat16), wsmall_ref[0:l1, 0:l2]), 9,
                     relu=False)

    # ---- out (cout padded to 128 lanes; wrapper slices column 0) -----------
    o_ref[...] = (mm(h.astype(jnp.bfloat16), wsmall_ref[l1:l1 + l2, :])
                  + p_ref[12:13, :]).astype(o_ref.dtype)


# ------------------------------- glue (JAX) -------------------------------- #

def _im2col(x_nhwc, k, stride):
    """(N,H,W,C) -> (N*Ho*Wo, k*k*C) with patch order (kh, kw, cin)."""
    n, h, w, c = x_nhwc.shape
    ho = (h - k) // stride + 1
    wo = (w - k) // stride + 1
    cols = []
    for di in range(k):
        for dj in range(k):
            cols.append(x_nhwc[:, di:di + (ho - 1) * stride + 1:stride,
                                  dj:dj + (wo - 1) * stride + 1:stride, :])
    patches = jnp.stack(cols, axis=3)                 # (N, Ho, Wo, k*k, C)
    return patches.reshape(n * ho * wo, k * k * c), (n, ho, wo)


def _expansion_consts(n, ho1, wo1, ho2, wo2, k):
    """Row-gather indices + BN row weights for the conv1->conv2 expansion.

    Expanded row i = kk*(ho2*wo2*n) + p*n + b holds conv1's output at
    location (p//wo2 + kk//k, p%wo2 + kk%k) of sample b.  The weights make
    the in-kernel weighted sums equal BN2d stats over the unique rows.
    """
    mult = np.zeros((ho1, wo1), np.float64)
    for di in range(k):
        for dj in range(k):
            mult[di:di + ho2, dj:dj + wo2] += 1.0
    total = n * ho1 * wo1
    idx, wts = [], []
    for kk in range(k * k):
        di, dj = divmod(kk, k)
        for p in range(ho2 * wo2):
            oi1, oj1 = p // wo2 + di, p % wo2 + dj
            for b in range(n):
                idx.append(b * ho1 * wo1 + oi1 * wo1 + oj1)
                wts.append(1.0 / (total * mult[oi1, oj1]))
    return np.asarray(idx, np.int32), np.asarray(wts, np.float32)


def init_params(key,
                conv1_channels=32, conv2_channels=64,
                linear1_neurons=64, linear2_neurons=32,
                fc1_in=64 * 3 * 3):
    ks = jax.random.split(key, 12)

    def w(k, shape, fan_in):
        return jax.random.normal(k, shape, jnp.float32) / jnp.sqrt(float(fan_in))

    def bias(k, m, fan_in):
        return jax.random.normal(k, (m,), jnp.float32) / jnp.sqrt(float(fan_in))

    return {
        # conv weights stored as (kh, kw, cin, cout)
        "conv1_w": w(ks[0], (3, 3, 43, conv1_channels), 3 * 3 * 43),
        "conv1_b": bias(ks[1], conv1_channels, 3 * 3 * 43),
        "conv2_w": w(ks[2], (3, 3, conv1_channels, conv2_channels),
                     3 * 3 * conv1_channels),
        "conv2_b": bias(ks[3], conv2_channels, 3 * 3 * conv1_channels),
        # linear weights stored as (in, out)
        "fc1_w": w(ks[4], (fc1_in, linear1_neurons), fc1_in),
        "fc1_b": bias(ks[5], linear1_neurons, fc1_in),
        "fc2_w": w(ks[6], (linear1_neurons, linear2_neurons), linear1_neurons),
        "fc2_b": bias(ks[7], linear2_neurons, linear1_neurons),
        "out_w": w(ks[8], (linear2_neurons, 1), linear2_neurons),
        "out_b": bias(ks[9], 1, linear2_neurons),
        # BatchNorm affine params (PyTorch init: gamma=1, beta=0)
        "bn1_g": jnp.ones((conv1_channels,), jnp.float32),
        "bn1_b": jnp.zeros((conv1_channels,), jnp.float32),
        "bn2_g": jnp.ones((conv2_channels,), jnp.float32),
        "bn2_b": jnp.zeros((conv2_channels,), jnp.float32),
        "bn3_g": jnp.ones((linear1_neurons,), jnp.float32),
        "bn3_b": jnp.zeros((linear1_neurons,), jnp.float32),
        "bn4_g": jnp.ones((linear2_neurons,), jnp.float32),
        "bn4_b": jnp.zeros((linear2_neurons,), jnp.float32),
    }


def cnn_forward(params, x_nchw):
    x = jnp.transpose(x_nchw, (0, 2, 3, 1)).astype(jnp.float32)     # NHWC

    c1 = params["conv1_w"].shape[-1]
    c2 = params["conv2_w"].shape[-1]
    l1 = params["fc1_w"].shape[-1]
    l2 = params["fc2_w"].shape[-1]

    # conv1 im2col (single cheap XLA fusion over the raw input).
    cols1, (n, ho1, wo1) = _im2col(x, KSIZE, 3)                      # (50, 387)
    ho2, wo2 = ho1 - (KSIZE - 1), wo1 - (KSIZE - 1)                  # conv2 out
    np2 = ho2 * wo2
    kk = KSIZE * KSIZE

    # Expanded im2col rows (one per (kernel-pos, conv2-out location, sample))
    # so conv1 + conv2's row gather become a single matmul each.
    idx, wts = _expansion_consts(n, ho1, wo1, ho2, wo2, KSIZE)       # (162,)
    r_pad = (-idx.shape[0]) % 8
    k1 = cols1.shape[1]
    k_pad = (-k1) % 8

    cols1exp = jnp.pad(cols1[idx], ((0, r_pad), (0, k_pad))
                       ).astype(jnp.bfloat16)                        # (168, 392)
    wexp = jnp.asarray(np.pad(wts, (0, r_pad)).reshape(-1, 1))       # (168, 1) f32

    w1m = jnp.pad(params["conv1_w"].reshape(k1, c1), ((0, k_pad), (0, 0))
                  ).astype(jnp.bfloat16)                             # (392, 32)

    # conv2 weight (K folded, rows = (kh,kw,cin)) stacked with fc1 weight
    # (rows regrouped as (spatial, channel) == the NCHW flatten permutation).
    w2big = params["conv2_w"].reshape(kk * c1, c2)
    wfc1 = params["fc1_w"].reshape(c2, np2, l1).transpose(1, 0, 2
                                                          ).reshape(np2 * c2, l1)
    wcat = jnp.concatenate([w2big, wfc1], axis=0).astype(jnp.bfloat16)

    # fc2 + out weights stacked into one lane-padded buffer.
    wsmall = jnp.zeros((l1 + l2, OUT_PAD), jnp.float32)
    wsmall = wsmall.at[:l1, :l2].set(params["fc2_w"])
    wsmall = wsmall.at[l1:, :params["out_w"].shape[1]].set(params["out_w"])
    wsmall = wsmall.astype(jnp.bfloat16)

    # All biases / BN affine params / out bias packed into one (16,128) slab.
    pslab = jnp.zeros((16, OUT_PAD), jnp.float32)

    def put(a, row, vec):
        return a.at[row, :vec.shape[0]].set(vec)

    pslab = put(pslab, 0, params["conv1_b"])
    pslab = put(pslab, 1, params["bn1_g"])
    pslab = put(pslab, 2, params["bn1_b"])
    pslab = put(pslab, 3, params["conv2_b"])
    pslab = put(pslab, 4, params["bn2_g"])
    pslab = put(pslab, 5, params["bn2_b"])
    pslab = put(pslab, 6, params["fc1_b"])
    pslab = put(pslab, 7, params["bn3_g"])
    pslab = put(pslab, 8, params["bn3_b"])
    pslab = put(pslab, 9, params["fc2_b"])
    pslab = put(pslab, 10, params["bn4_g"])
    pslab = put(pslab, 11, params["bn4_b"])
    pslab = put(pslab, 12, params["out_b"])

    kernel = partial(_cnn_kernel, n=n, np2=np2, kk=kk,
                     c1=c1, c2=c2, l1=l1, l2=l2)

    out = pl.pallas_call(
        kernel,
        out_shape=jax.ShapeDtypeStruct((n, OUT_PAD), jnp.float32),
        in_specs=[pl.BlockSpec(memory_space=pltpu.MemorySpace.VMEM)] * 6,
        out_specs=pl.BlockSpec(memory_space=pltpu.MemorySpace.VMEM),
        scratch_shapes=[
            pltpu.VMEM((n * np2, kk * c1), jnp.bfloat16),   # conv2 im2col
            pltpu.VMEM((n, np2 * c2), jnp.bfloat16),        # fc1 flatten
        ],
    )(cols1exp, w1m, wcat, wsmall, pslab, wexp)

    return out[:, :1]


# --------------------------- pure-JAX reference ----------------------------- #

def reference_forward(params, x_nchw):
    bf, f32 = jnp.bfloat16, jnp.float32
    x = jnp.transpose(x_nchw, (0, 2, 3, 1)).astype(f32)

    def conv(x, w, b, stride):
        y = lax.conv_general_dilated(
            x.astype(bf), w.astype(bf), (stride, stride), "VALID",
            dimension_numbers=("NHWC", "HWIO", "NHWC"),
            preferred_element_type=f32)
        return y + b

    def mm(a, b):
        return jnp.dot(a.astype(bf), b.astype(bf), preferred_element_type=f32)

    def bn(y, g, be, axes):
        m = jnp.mean(y, axis=axes, keepdims=True)
        yc = y - m
        v = jnp.mean(yc * yc, axis=axes, keepdims=True)
        return yc * lax.rsqrt(v + EPS) * g + be

    y = bn(jnp.maximum(conv(x, params["conv1_w"], params["conv1_b"], 3), 0.0),
           params["bn1_g"], params["bn1_b"], (0, 1, 2))
    y = bn(jnp.maximum(conv(y, params["conv2_w"], params["conv2_b"], 1), 0.0),
           params["bn2_g"], params["bn2_b"], (0, 1, 2))
    n = y.shape[0]
    y = jnp.transpose(y, (0, 3, 1, 2)).reshape(n, -1)                # NCHW flat
    y = bn(jnp.maximum(mm(y, params["fc1_w"]) + params["fc1_b"], 0.0),
           params["bn3_g"], params["bn3_b"], (0,))
    y = bn(mm(y, params["fc2_w"]) + params["fc2_b"],
           params["bn4_g"], params["bn4_b"], (0,))
    return mm(y, params["out_w"]) + params["out_b"]


# --------------------------------- main ------------------------------------- #

if __name__ == "__main__":
    key = jax.random.PRNGKey(0)
    pkey, xkey = jax.random.split(key)

    # batch=2, 43 input channels (required by conv1), 15x15 spatial
    #   conv1 (k=3,s=3) -> 5x5 ; conv2 (k=3,s=1) -> 3x3 ; flatten -> 64*9 = 576
    x = jax.random.normal(xkey, (2, 43, 15, 15), jnp.float32)
    params = init_params(pkey, fc1_in=64 * 3 * 3)

    y = jax.jit(cnn_forward)(params, x)
    y = jax.block_until_ready(y)
    assert y.shape == (2, 1), y.shape

    y_ref = reference_forward(params, x)
    if not bool(jnp.allclose(y, y_ref, atol=2e-3, rtol=2e-3)):
        raise AssertionError(f"mismatch vs reference: {y} vs {y_ref}")

    print("KERNEL_OK")
</pallas_src>

<mosaic_0001>
module attributes {stable_mosaic.version = 11 : i64} {
  func.func @_cnn_kernel(%arg0: memref<168x392xbf16, #tpu.memory_space<vmem>>, %arg1: memref<392x32xbf16, #tpu.memory_space<vmem>>, %arg2: memref<864x64xbf16, #tpu.memory_space<vmem>>, %arg3: memref<96x128xbf16, #tpu.memory_space<vmem>>, %arg4: memref<16x128xf32, #tpu.memory_space<vmem>>, %arg5: memref<168x1xf32, #tpu.memory_space<vmem>>, %arg6: memref<2x128xf32, #tpu.memory_space<vmem>>, %arg7: memref<18x288xbf16, #tpu.memory_space<vmem>>, %arg8: memref<2x576xbf16, #tpu.memory_space<vmem>>) attributes {dimension_semantics = [], scalar_prefetch = 0 : i64, scratch_operands = 2 : i64, tpu.core_type = #tpu.core_type<tc>} {
    %c0 = arith.constant 0 : index
    %c0_0 = arith.constant 0 : index
    %0 = vector.load %arg0[%c0, %c0_0] : memref<168x392xbf16, #tpu.memory_space<vmem>>, vector<168x392xbf16>
    %c0_1 = arith.constant 0 : index
    %c0_2 = arith.constant 0 : index
    %1 = vector.load %arg1[%c0_1, %c0_2] : memref<392x32xbf16, #tpu.memory_space<vmem>>, vector<392x32xbf16>
    %cst = arith.constant dense<0.000000e+00> : vector<168x32xf32>
    %2 = tpu.matmul %0, %1, %cst {dimension_numbers = #tpu.dot_dimension_numbers<[1], [0], [0], [1], [0, 0, 1, 1], [], []>} : vector<168x392xbf16>, vector<392x32xbf16>, vector<168x32xf32> -> vector<168x32xf32>
    %c0_3 = arith.constant 0 : index
    %c0_4 = arith.constant 0 : index
    %3 = vector.load %arg5[%c0_3, %c0_4] : memref<168x1xf32, #tpu.memory_space<vmem>>, vector<168x1xf32>
    %c0_5 = arith.constant 0 : index
    %c0_6 = arith.constant 0 : index
    %4 = vector.load %arg4[%c0_5, %c0_6] : memref<16x128xf32, #tpu.memory_space<vmem>>, vector<1x32xf32>
    %5 = vector.broadcast %4 : vector<1x32xf32> to vector<168x32xf32>
    %6 = arith.addf %2, %5 : vector<168x32xf32>
    %cst_7 = arith.constant 0.000000e+00 : f32
    %7 = vector.broadcast %cst_7 : f32 to vector<168x32xf32>
    %8 = arith.maximumf %6, %7 : vector<168x32xf32>
    %9 = vector.broadcast %3 : vector<168x1xf32> to vector<168x32xf32>
    %10 = arith.mulf %8, %9 : vector<168x32xf32>
    %cst_8 = arith.constant dense<0.000000e+00> : vector<32xf32>
    %11 = vector.multi_reduction <add>, %10, %cst_8 [0] : vector<168x32xf32> to vector<32xf32>
    %12 = vector.shape_cast %11 : vector<32xf32> to vector<1x32xf32>
    %13 = vector.broadcast %12 : vector<1x32xf32> to vector<168x32xf32>
    %14 = arith.subf %8, %13 : vector<168x32xf32>
    %15 = arith.mulf %14, %14 : vector<168x32xf32>
    %16 = vector.broadcast %3 : vector<168x1xf32> to vector<168x32xf32>
    %17 = arith.mulf %15, %16 : vector<168x32xf32>
    %cst_9 = arith.constant dense<0.000000e+00> : vector<32xf32>
    %18 = vector.multi_reduction <add>, %17, %cst_9 [0] : vector<168x32xf32> to vector<32xf32>
    %19 = vector.shape_cast %18 : vector<32xf32> to vector<1x32xf32>
    %cst_10 = arith.constant 9.99999974E-6 : f32
    %20 = vector.broadcast %cst_10 : f32 to vector<1x32xf32>
    %21 = arith.addf %19, %20 : vector<1x32xf32>
    %22 = math.rsqrt %21 : vector<1x32xf32>
    %23 = vector.broadcast %22 : vector<1x32xf32> to vector<168x32xf32>
    %24 = arith.mulf %14, %23 : vector<168x32xf32>
    %c1 = arith.constant 1 : index
    %c0_11 = arith.constant 0 : index
    %25 = vector.load %arg4[%c1, %c0_11] : memref<16x128xf32, #tpu.memory_space<vmem>>, vector<1x32xf32>
    %26 = vector.broadcast %25 : vector<1x32xf32> to vector<168x32xf32>
    %27 = arith.mulf %24, %26 : vector<168x32xf32>
    %c2 = arith.constant 2 : index
    %c0_12 = arith.constant 0 : index
    %28 = vector.load %arg4[%c2, %c0_12] : memref<16x128xf32, #tpu.memory_space<vmem>>, vector<1x32xf32>
    %29 = vector.broadcast %28 : vector<1x32xf32> to vector<168x32xf32>
    %30 = arith.addf %27, %29 : vector<168x32xf32>
    %31 = arith.truncf %30 : vector<168x32xf32> to vector<168x32xbf16>
    %32 = vector.extract_strided_slice %31 {offsets = [0, 0], sizes = [18, 32], strides = [1, 1]} : vector<168x32xbf16> to vector<18x32xbf16>
    %c0_13 = arith.constant 0 : index
    %c0_14 = arith.constant 0 : index
    %33 = vector.load %arg7[%c0_13, %c0_14] : memref<18x288xbf16, #tpu.memory_space<vmem>>, vector<18x32xbf16>
    tpu.vector_store %arg7[%c0_13, %c0_14], %32 {strides = array<i32>} : memref<18x288xbf16, #tpu.memory_space<vmem>>, vector<18x32xbf16>,
    %34 = vector.extract_strided_slice %31 {offsets = [18, 0], sizes = [18, 32], strides = [1, 1]} : vector<168x32xbf16> to vector<18x32xbf16>
    %c0_15 = arith.constant 0 : index
    %c32 = arith.constant 32 : index
    %35 = vector.load %arg7[%c0_15, %c32] : memref<18x288xbf16, #tpu.memory_space<vmem>>, vector<18x32xbf16>
    tpu.vector_store %arg7[%c0_15, %c32], %34 {strides = array<i32>} : memref<18x288xbf16, #tpu.memory_space<vmem>>, vector<18x32xbf16>,
    %36 = vector.extract_strided_slice %31 {offsets = [36, 0], sizes = [18, 32], strides = [1, 1]} : vector<168x32xbf16> to vector<18x32xbf16>
    %c0_16 = arith.constant 0 : index
    %c64 = arith.constant 64 : index
    %37 = vector.load %arg7[%c0_16, %c64] : memref<18x288xbf16, #tpu.memory_space<vmem>>, vector<18x32xbf16>
    tpu.vector_store %arg7[%c0_16, %c64], %36 {strides = array<i32>} : memref<18x288xbf16, #tpu.memory_space<vmem>>, vector<18x32xbf16>,
    %38 = vector.extract_strided_slice %31 {offsets = [54, 0], sizes = [18, 32], strides = [1, 1]} : vector<168x32xbf16> to vector<18x32xbf16>
    %c0_17 = arith.constant 0 : index
    %c96 = arith.constant 96 : index
    %39 = vector.load %arg7[%c0_17, %c96] : memref<18x288xbf16, #tpu.memory_space<vmem>>, vector<18x32xbf16>
    tpu.vector_store %arg7[%c0_17, %c96], %38 {strides = array<i32>} : memref<18x288xbf16, #tpu.memory_space<vmem>>, vector<18x32xbf16>,
    %40 = vector.extract_strided_slice %31 {offsets = [72, 0], sizes = [18, 32], strides = [1, 1]} : vector<168x32xbf16> to vector<18x32xbf16>
    %c0_18 = arith.constant 0 : index
    %c128 = arith.constant 128 : index
    %41 = vector.load %arg7[%c0_18, %c128] : memref<18x288xbf16, #tpu.memory_space<vmem>>, vector<18x32xbf16>
    tpu.vector_store %arg7[%c0_18, %c128], %40 {strides = array<i32>} : memref<18x288xbf16, #tpu.memory_space<vmem>>, vector<18x32xbf16>,
    %42 = vector.extract_strided_slice %31 {offsets = [90, 0], sizes = [18, 32], strides = [1, 1]} : vector<168x32xbf16> to vector<18x32xbf16>
    %c0_19 = arith.constant 0 : index
    %c160 = arith.constant 160 : index
    %43 = vector.load %arg7[%c0_19, %c160] : memref<18x288xbf16, #tpu.memory_space<vmem>>, vector<18x32xbf16>
    tpu.vector_store %arg7[%c0_19, %c160], %42 {strides = array<i32>} : memref<18x288xbf16, #tpu.memory_space<vmem>>, vector<18x32xbf16>,
    %44 = vector.extract_strided_slice %31 {offsets = [108, 0], sizes = [18, 32], strides = [1, 1]} : vector<168x32xbf16> to vector<18x32xbf16>
    %c0_20 = arith.constant 0 : index
    %c192 = arith.constant 192 : index
    %45 = vector.load %arg7[%c0_20, %c192] : memref<18x288xbf16, #tpu.memory_space<vmem>>, vector<18x32xbf16>
    tpu.vector_store %arg7[%c0_20, %c192], %44 {strides = array<i32>} : memref<18x288xbf16, #tpu.memory_space<vmem>>, vector<18x32xbf16>,
    %46 = vector.extract_strided_slice %31 {offsets = [126, 0], sizes = [18, 32], strides = [1, 1]} : vector<168x32xbf16> to vector<18x32xbf16>
    %c0_21 = arith.constant 0 : index
    %c224 = arith.constant 224 : index
    %47 = vector.load %arg7[%c0_21, %c224] : memref<18x288xbf16, #tpu.memory_space<vmem>>, vector<18x32xbf16>
    tpu.vector_store %arg7[%c0_21, %c224], %46 {strides = array<i32>} : memref<18x288xbf16, #tpu.memory_space<vmem>>, vector<18x32xbf16>,
    %48 = vector.extract_strided_slice %31 {offsets = [144, 0], sizes = [18, 32], strides = [1, 1]} : vector<168x32xbf16> to vector<18x32xbf16>
    %c0_22 = arith.constant 0 : index
    %c256 = arith.constant 256 : index
    %49 = vector.load %arg7[%c0_22, %c256] : memref<18x288xbf16, #tpu.memory_space<vmem>>, vector<18x32xbf16>
    tpu.vector_store %arg7[%c0_22, %c256], %48 {strides = array<i32>} : memref<18x288xbf16, #tpu.memory_space<vmem>>, vector<18x32xbf16>,
    %c0_23 = arith.constant 0 : index
    %c0_24 = arith.constant 0 : index
    %50 = vector.load %arg7[%c0_23, %c0_24] : memref<18x288xbf16, #tpu.memory_space<vmem>>, vector<18x288xbf16>
    %c0_25 = arith.constant 0 : index
    %c0_26 = arith.constant 0 : index
    %51 = vector.load %arg2[%c0_25, %c0_26] : memref<864x64xbf16, #tpu.memory_space<vmem>>, vector<288x64xbf16>
    %cst_27 = arith.constant dense<0.000000e+00> : vector<18x64xf32>
    %52 = tpu.matmul %50, %51, %cst_27 {dimension_numbers = #tpu.dot_dimension_numbers<[1], [0], [0], [1], [0, 0, 1, 1], [], []>} : vector<18x288xbf16>, vector<288x64xbf16>, vector<18x64xf32> -> vector<18x64xf32>
    %c3 = arith.constant 3 : index
    %c0_28 = arith.constant 0 : index
    %53 = vector.load %arg4[%c3, %c0_28] : memref<16x128xf32, #tpu.memory_space<vmem>>, vector<1x64xf32>
    %54 = vector.broadcast %53 : vector<1x64xf32> to vector<18x64xf32>
    %55 = arith.addf %52, %54 : vector<18x64xf32>
    %cst_29 = arith.constant 0.000000e+00 : f32
    %56 = vector.broadcast %cst_29 : f32 to vector<18x64xf32>
    %57 = arith.maximumf %55, %56 : vector<18x64xf32>
    %cst_30 = arith.constant dense<0.000000e+00> : vector<64xf32>
    %58 = vector.multi_reduction <add>, %57, %cst_30 [0] : vector<18x64xf32> to vector<64xf32>
    %59 = vector.shape_cast %58 : vector<64xf32> to vector<1x64xf32>
    %cst_31 = arith.constant 1.800000e+01 : f32
    %60 = vector.broadcast %cst_31 : f32 to vector<1x64xf32>
    %61 = arith.divf %59, %60 : vector<1x64xf32>
    %62 = vector.broadcast %61 : vector<1x64xf32> to vector<18x64xf32>
    %63 = arith.subf %57, %62 : vector<18x64xf32>
    %64 = arith.mulf %63, %63 : vector<18x64xf32>
    %cst_32 = arith.constant dense<0.000000e+00> : vector<64xf32>
    %65 = vector.multi_reduction <add>, %64, %cst_32 [0] : vector<18x64xf32> to vector<64xf32>
    %66 = vector.shape_cast %65 : vector<64xf32> to vector<1x64xf32>
    %cst_33 = arith.constant 1.800000e+01 : f32
    %67 = vector.broadcast %cst_33 : f32 to vector<1x64xf32>
    %68 = arith.divf %66, %67 : vector<1x64xf32>
    %cst_34 = arith.constant 9.99999974E-6 : f32
    %69 = vector.broadcast %cst_34 : f32 to vector<1x64xf32>
    %70 = arith.addf %68, %69 : vector<1x64xf32>
    %71 = math.rsqrt %70 : vector<1x64xf32>
    %72 = vector.broadcast %71 : vector<1x64xf32> to vector<18x64xf32>
    %73 = arith.mulf %63, %72 : vector<18x64xf32>
    %c4 = arith.constant 4 : index
    %c0_35 = arith.constant 0 : index
    %74 = vector.load %arg4[%c4, %c0_35] : memref<16x128xf32, #tpu.memory_space<vmem>>, vector<1x64xf32>
    %75 = vector.broadcast %74 : vector<1x64xf32> to vector<18x64xf32>
    %76 = arith.mulf %73, %75 : vector<18x64xf32>
    %c5 = arith.constant 5 : index
    %c0_36 = arith.constant 0 : index
    %77 = vector.load %arg4[%c5, %c0_36] : memref<16x128xf32, #tpu.memory_space<vmem>>, vector<1x64xf32>
    %78 = vector.broadcast %77 : vector<1x64xf32> to vector<18x64xf32>
    %79 = arith.addf %76, %78 : vector<18x64xf32>
    %80 = arith.truncf %79 : vector<18x64xf32> to vector<18x64xbf16>
    %81 = vector.extract_strided_slice %80 {offsets = [0, 0], sizes = [2, 64], strides = [1, 1]} : vector<18x64xbf16> to vector<2x64xbf16>
    %c0_37 = arith.constant 0 : index
    %c0_38 = arith.constant 0 : index
    %82 = vector.load %arg8[%c0_37, %c0_38] : memref<2x576xbf16, #tpu.memory_space<vmem>>, vector<2x64xbf16>
    tpu.vector_store %arg8[%c0_37, %c0_38], %81 {strides = array<i32>} : memref<2x576xbf16, #tpu.memory_space<vmem>>, vector<2x64xbf16>,
    %83 = vector.extract_strided_slice %80 {offsets = [2, 0], sizes = [2, 64], strides = [1, 1]} : vector<18x64xbf16> to vector<2x64xbf16>
    %c0_39 = arith.constant 0 : index
    %c64_40 = arith.constant 64 : index
    %84 = vector.load %arg8[%c0_39, %c64_40] : memref<2x576xbf16, #tpu.memory_space<vmem>>, vector<2x64xbf16>
    tpu.vector_store %arg8[%c0_39, %c64_40], %83 {strides = array<i32>} : memref<2x576xbf16, #tpu.memory_space<vmem>>, vector<2x64xbf16>,
    %85 = vector.extract_strided_slice %80 {offsets = [4, 0], sizes = [2, 64], strides = [1, 1]} : vector<18x64xbf16> to vector<2x64xbf16>
    %c0_41 = arith.constant 0 : index
    %c128_42 = arith.constant 128 : index
    %86 = vector.load %arg8[%c0_41, %c128_42] : memref<2x576xbf16, #tpu.memory_space<vmem>>, vector<2x64xbf16>
    tpu.vector_store %arg8[%c0_41, %c128_42], %85 {strides = array<i32>} : memref<2x576xbf16, #tpu.memory_space<vmem>>, vector<2x64xbf16>,
    %87 = vector.extract_strided_slice %80 {offsets = [6, 0], sizes = [2, 64], strides = [1, 1]} : vector<18x64xbf16> to vector<2x64xbf16>
    %c0_43 = arith.constant 0 : index
    %c192_44 = arith.constant 192 : index
    %88 = vector.load %arg8[%c0_43, %c192_44] : memref<2x576xbf16, #tpu.memory_space<vmem>>, vector<2x64xbf16>
    tpu.vector_store %arg8[%c0_43, %c192_44], %87 {strides = array<i32>} : memref<2x576xbf16, #tpu.memory_space<vmem>>, vector<2x64xbf16>,
    %89 = vector.extract_strided_slice %80 {offsets = [8, 0], sizes = [2, 64], strides = [1, 1]} : vector<18x64xbf16> to vector<2x64xbf16>
    %c0_45 = arith.constant 0 : index
    %c256_46 = arith.constant 256 : index
    %90 = vector.load %arg8[%c0_45, %c256_46] : memref<2x576xbf16, #tpu.memory_space<vmem>>, vector<2x64xbf16>
    tpu.vector_store %arg8[%c0_45, %c256_46], %89 {strides = array<i32>} : memref<2x576xbf16, #tpu.memory_space<vmem>>, vector<2x64xbf16>,
    %91 = vector.extract_strided_slice %80 {offsets = [10, 0], sizes = [2, 64], strides = [1, 1]} : vector<18x64xbf16> to vector<2x64xbf16>
    %c0_47 = arith.constant 0 : index
    %c320 = arith.constant 320 : index
    %92 = vector.load %arg8[%c0_47, %c320] : memref<2x576xbf16, #tpu.memory_space<vmem>>, vector<2x64xbf16>
    tpu.vector_store %arg8[%c0_47, %c320], %91 {strides = array<i32>} : memref<2x576xbf16, #tpu.memory_space<vmem>>, vector<2x64xbf16>,
    %93 = vector.extract_strided_slice %80 {offsets = [12, 0], sizes = [2, 64], strides = [1, 1]} : vector<18x64xbf16> to vector<2x64xbf16>
    %c0_48 = arith.constant 0 : index
    %c384 = arith.constant 384 : index
    %94 = vector.load %arg8[%c0_48, %c384] : memref<2x576xbf16, #tpu.memory_space<vmem>>, vector<2x64xbf16>
    tpu.vector_store %arg8[%c0_48, %c384], %93 {strides = array<i32>} : memref<2x576xbf16, #tpu.memory_space<vmem>>, vector<2x64xbf16>,
    %95 = vector.extract_strided_slice %80 {offsets = [14, 0], sizes = [2, 64], strides = [1, 1]} : vector<18x64xbf16> to vector<2x64xbf16>
    %c0_49 = arith.constant 0 : index
    %c448 = arith.constant 448 : index
    %96 = vector.load %arg8[%c0_49, %c448] : memref<2x576xbf16, #tpu.memory_space<vmem>>, vector<2x64xbf16>
    tpu.vector_store %arg8[%c0_49, %c448], %95 {strides = array<i32>} : memref<2x576xbf16, #tpu.memory_space<vmem>>, vector<2x64xbf16>,
    %97 = vector.extract_strided_slice %80 {offsets = [16, 0], sizes = [2, 64], strides = [1, 1]} : vector<18x64xbf16> to vector<2x64xbf16>
    %c0_50 = arith.constant 0 : index
    %c512 = arith.constant 512 : index
    %98 = vector.load %arg8[%c0_50, %c512] : memref<2x576xbf16, #tpu.memory_space<vmem>>, vector<2x64xbf16>
    tpu.vector_store %arg8[%c0_50, %c512], %97 {strides = array<i32>} : memref<2x576xbf16, #tpu.memory_space<vmem>>, vector<2x64xbf16>,
    %c0_51 = arith.constant 0 : index
    %c0_52 = arith.constant 0 : index
    %99 = vector.load %arg8[%c0_51, %c0_52] : memref<2x576xbf16, #tpu.memory_space<vmem>>, vector<2x576xbf16>
    %c288 = arith.constant 288 : index
    %c0_53 = arith.constant 0 : index
    %100 = vector.load %arg2[%c288, %c0_53] : memref<864x64xbf16, #tpu.memory_space<vmem>>, vector<576x64xbf16>
    %cst_54 = arith.constant dense<0.000000e+00> : vector<2x64xf32>
    %101 = tpu.matmul %99, %100, %cst_54 {dimension_numbers = #tpu.dot_dimension_numbers<[1], [0], [0], [1], [0, 0, 1, 1], [], []>} : vector<2x576xbf16>, vector<576x64xbf16>, vector<2x64xf32> -> vector<2x64xf32>
    %c6 = arith.constant 6 : index
    %c0_55 = arith.constant 0 : index
    %102 = vector.load %arg4[%c6, %c0_55] : memref<16x128xf32, #tpu.memory_space<vmem>>, vector<1x64xf32>
    %103 = vector.broadcast %102 : vector<1x64xf32> to vector<2x64xf32>
    %104 = arith.addf %101, %103 : vector<2x64xf32>
    %cst_56 = arith.constant 0.000000e+00 : f32
    %105 = vector.broadcast %cst_56 : f32 to vector<2x64xf32>
    %106 = arith.maximumf %104, %105 : vector<2x64xf32>
    %cst_57 = arith.constant dense<0.000000e+00> : vector<64xf32>
    %107 = vector.multi_reduction <add>, %106, %cst_57 [0] : vector<2x64xf32> to vector<64xf32>
    %108 = vector.shape_cast %107 : vector<64xf32> to vector<1x64xf32>
    %cst_58 = arith.constant 2.000000e+00 : f32
    %109 = vector.broadcast %cst_58 : f32 to vector<1x64xf32>
    %110 = arith.divf %108, %109 : vector<1x64xf32>
    %111 = vector.broadcast %110 : vector<1x64xf32> to vector<2x64xf32>
    %112 = arith.subf %106, %111 : vector<2x64xf32>
    %113 = arith.mulf %112, %112 : vector<2x64xf32>
    %cst_59 = arith.constant dense<0.000000e+00> : vector<64xf32>
    %114 = vector.multi_reduction <add>, %113, %cst_59 [0] : vector<2x64xf32> to vector<64xf32>
    %115 = vector.shape_cast %114 : vector<64xf32> to vector<1x64xf32>
    %cst_60 = arith.constant 2.000000e+00 : f32
    %116 = vector.broadcast %cst_60 : f32 to vector<1x64xf32>
    %117 = arith.divf %115, %116 : vector<1x64xf32>
    %cst_61 = arith.constant 9.99999974E-6 : f32
    %118 = vector.broadcast %cst_61 : f32 to vector<1x64xf32>
    %119 = arith.addf %117, %118 : vector<1x64xf32>
    %120 = math.rsqrt %119 : vector<1x64xf32>
    %121 = vector.broadcast %120 : vector<1x64xf32> to vector<2x64xf32>
    %122 = arith.mulf %112, %121 : vector<2x64xf32>
    %c7 = arith.constant 7 : index
    %c0_62 = arith.constant 0 : index
    %123 = vector.load %arg4[%c7, %c0_62] : memref<16x128xf32, #tpu.memory_space<vmem>>, vector<1x64xf32>
    %124 = vector.broadcast %123 : vector<1x64xf32> to vector<2x64xf32>
    %125 = arith.mulf %122, %124 : vector<2x64xf32>
    %c8 = arith.constant 8 : index
    %c0_63 = arith.constant 0 : index
    %126 = vector.load %arg4[%c8, %c0_63] : memref<16x128xf32, #tpu.memory_space<vmem>>, vector<1x64xf32>
    %127 = vector.broadcast %126 : vector<1x64xf32> to vector<2x64xf32>
    %128 = arith.addf %125, %127 : vector<2x64xf32>
    %129 = arith.truncf %128 : vector<2x64xf32> to vector<2x64xbf16>
    %c0_64 = arith.constant 0 : index
    %c0_65 = arith.constant 0 : index
    %130 = vector.load %arg3[%c0_64, %c0_65] : memref<96x128xbf16, #tpu.memory_space<vmem>>, vector<64x32xbf16>
    %cst_66 = arith.constant dense<0.000000e+00> : vector<2x32xf32>
    %131 = tpu.matmul %129, %130, %cst_66 {dimension_numbers = #tpu.dot_dimension_numbers<[1], [0], [0], [1], [0, 0, 1, 1], [], []>} : vector<2x64xbf16>, vector<64x32xbf16>, vector<2x32xf32> -> vector<2x32xf32>
    %c9 = arith.constant 9 : index
    %c0_67 = arith.constant 0 : index
    %132 = vector.load %arg4[%c9, %c0_67] : memref<16x128xf32, #tpu.memory_space<vmem>>, vector<1x32xf32>
    %133 = vector.broadcast %132 : vector<1x32xf32> to vector<2x32xf32>
    %134 = arith.addf %131, %133 : vector<2x32xf32>
    %cst_68 = arith.constant dense<0.000000e+00> : vector<32xf32>
    %135 = vector.multi_reduction <add>, %134, %cst_68 [0] : vector<2x32xf32> to vector<32xf32>
    %136 = vector.shape_cast %135 : vector<32xf32> to vector<1x32xf32>
    %cst_69 = arith.constant 2.000000e+00 : f32
    %137 = vector.broadcast %cst_69 : f32 to vector<1x32xf32>
    %138 = arith.divf %136, %137 : vector<1x32xf32>
    %139 = vector.broadcast %138 : vector<1x32xf32> to vector<2x32xf32>
    %140 = arith.subf %134, %139 : vector<2x32xf32>
    %141 = arith.mulf %140, %140 : vector<2x32xf32>
    %cst_70 = arith.constant dense<0.000000e+00> : vector<32xf32>
    %142 = vector.multi_reduction <add>, %141, %cst_70 [0] : vector<2x32xf32> to vector<32xf32>
    %143 = vector.shape_cast %142 : vector<32xf32> to vector<1x32xf32>
    %cst_71 = arith.constant 2.000000e+00 : f32
    %144 = vector.broadcast %cst_71 : f32 to vector<1x32xf32>
    %145 = arith.divf %143, %144 : vector<1x32xf32>
    %cst_72 = arith.constant 9.99999974E-6 : f32
    %146 = vector.broadcast %cst_72 : f32 to vector<1x32xf32>
    %147 = arith.addf %145, %146 : vector<1x32xf32>
    %148 = math.rsqrt %147 : vector<1x32xf32>
    %149 = vector.broadcast %148 : vector<1x32xf32> to vector<2x32xf32>
    %150 = arith.mulf %140, %149 : vector<2x32xf32>
    %c10 = arith.constant 10 : index
    %c0_73 = arith.constant 0 : index
    %151 = vector.load %arg4[%c10, %c0_73] : memref<16x128xf32, #tpu.memory_space<vmem>>, vector<1x32xf32>
    %152 = vector.broadcast %151 : vector<1x32xf32> to vector<2x32xf32>
    %153 = arith.mulf %150, %152 : vector<2x32xf32>
    %c11 = arith.constant 11 : index
    %c0_74 = arith.constant 0 : index
    %154 = vector.load %arg4[%c11, %c0_74] : memref<16x128xf32, #tpu.memory_space<vmem>>, vector<1x32xf32>
    %155 = vector.broadcast %154 : vector<1x32xf32> to vector<2x32xf32>
    %156 = arith.addf %153, %155 : vector<2x32xf32>
    %157 = arith.truncf %156 : vector<2x32xf32> to vector<2x32xbf16>
    %c64_75 = arith.constant 64 : index
    %c0_76 = arith.constant 0 : index
    %158 = vector.load %arg3[%c64_75, %c0_76] : memref<96x128xbf16, #tpu.memory_space<vmem>>, vector<32x128xbf16>
    %cst_77 = arith.constant dense<0.000000e+00> : vector<2x128xf32>
    %159 = tpu.matmul %157, %158, %cst_77 {dimension_numbers = #tpu.dot_dimension_numbers<[1], [0], [0], [1], [0, 0, 1, 1], [], []>} : vector<2x32xbf16>, vector<32x128xbf16>, vector<2x128xf32> -> vector<2x128xf32>
    %c12 = arith.constant 12 : index
    %c0_78 = arith.constant 0 : index
    %160 = vector.load %arg4[%c12, %c0_78] : memref<16x128xf32, #tpu.memory_space<vmem>>, vector<1x128xf32>
    %161 = vector.broadcast %160 : vector<1x128xf32> to vector<2x128xf32>
    %162 = arith.addf %159, %161 : vector<2x128xf32>
    %c0_79 = arith.constant 0 : index
    %c0_80 = arith.constant 0 : index
    %163 = vector.load %arg6[%c0_79, %c0_80] : memref<2x128xf32, #tpu.memory_space<vmem>>, vector<2x128xf32>
    tpu.vector_store %arg6[%c0_79, %c0_80], %162 {strides = array<i32>} : memref<2x128xf32, #tpu.memory_space<vmem>>, vector<2x128xf32>,
    return
  }
}

</mosaic_0001>

<bundles_post_ra>
// kernel: cnn_forward.1
= control target key start
LH: loop header
LB: loop body
LE: loop exit
PB: predicated region body
PF: predicated region fallthrough
CT: control target
= control target key end

     0   :  { %v3064_v0 = vmov 0   ;;  %vm491_vm0 = vcmask 64512   ;;  %vm525_vm1 = vcmask 1043456   ;;  %vm916_vm2 = vcmask 261120   ;;  %s3065_s29 = smov 32   ;;  %s3066_s9 = smov 64   ;;  %s4202_s1 = inlined_call_operand.vmem [shape: bf16[392,32], index: 1, kind: input, shape index: {}]   ;;  %s4203_s0 = inlined_call_operand.vmem [shape: bf16[168,392], index: 0, kind: input, shape index: {}]   ;;  %s4204_s5 = inlined_call_operand.vmem [shape: f32[168,1], index: 5, kind: input, shape index: {}]   ;;  %s4205_s4 = inlined_call_operand.vmem [shape: f32[16,128], index: 4, kind: input, shape index: {}]   ;;  %s4206_s2 = inlined_call_operand.vmem [shape: bf16[864,64], index: 2, kind: input, shape index: {}]   ;;  %s4207_s3 = inlined_call_operand.vmem [shape: bf16[96,128], index: 3, kind: input, shape index: {}]   ;;  %s4208_s6 = inlined_call_operand.vmem [shape: f32[2,128], index: 6, kind: output, shape index: {}]  }
   0x1   :  { %649 = vmatprep.subr.bf16.mxu1 %v3064_v0  ;;  %v2899_v1 = vld [vmem:[%s4202_s1 + $0x40] sm:$0xff]   ;;  %2897 = vset.pattern.permute.xlu0 %v3064_v0  ;;  %v2902_v4 = vld [vmem:[%s4202_s1 + $0x48] sm:$0xff]   ;;  %v2905_v7 = vld [vmem:[%s4202_s1 + $0x50] sm:$0xff]   ;;  %vm1171_vm3 = vcmask 257024   ;;  %vm1174_vm4 = vcmask 253952   ;;  %vm1181_vm5 = vcmask 1042432  }
   0x2   :  { %v2900_v2 = vld [vmem:[%s4202_s1 + $0x80] sm:$0xff]   ;;  %2898 = vset.pattern.permute.xlu1 %v3064_v0  ;;  %2679 = vmatprep.subr.bf16.mxu0 %v2899_v1  ;;  %v2903_v5 = vld [vmem:[%s4202_s1 + $0x88] sm:$0xff]   ;;  %v2906_v8 = vld [vmem:[%s4202_s1 + $0x90] sm:$0xff]   ;;  %vm1182_vm6 = vcmask 1046532   ;;  %vm1211_vm7 = vcmask 1041408   ;;  %vm1212_vm8 = vcmask 1045508  }
   0x3   :  { %v2901_v3 = vld [vmem:[%s4202_s1] sm:$0xff]   ;;  %650 = vmatpush1.bf16.msra.mxu1 %v2900_v2  ;;  %v2904_v6 = vld [vmem:[%s4202_s1 + $0x8] sm:$0xff]   ;;  %v2907_v9 = vld [vmem:[%s4202_s1 + $0x10] sm:$0xff]   ;;  %vm1241_vm10 = vcmask 1040384   ;;  %vm1242_vm11 = vcmask 1044484   ;;  %s3067_s13 = smov 96  }
   0x4   :  { %2680 = vmatpush3.bf16.msra.mxu0 %v2901_v3  ;;  %651 = vmatprep.subr.bf16.mxu1 %v3064_v0  ;;  %v2908_v10 = vld [vmem:[%s4202_s1 + $0x58] sm:$0xff]   ;;  %v2911_v13 = vld [vmem:[%s4202_s1 + $0x60] sm:$0xff]   ;;  %v2914_v16 = vld [vmem:[%s4202_s1 + $0x68] sm:$0xff]   ;;  %vm1201_vm14 = vcmask 519424   ;;  %vm1204_vm15 = vcmask 516352  }
   0x5   :  { %2681 = vmatprep.subr.bf16.mxu0 %v2902_v4  ;;  %v2909_v11 = vld [vmem:[%s4202_s1 + $0x98] sm:$0xff]   ;;  %v2912_v14 = vld [vmem:[%s4202_s1 + $0xa0] sm:$0xff]   ;;  %v2915_v17 = vld [vmem:[%s4202_s1 + $0xa8] sm:$0xff]  }
   0x6   :  { %v2910_v12 = vld [vmem:[%s4202_s1 + $0x18] sm:$0xff]   ;;  %v2913_v15 = vld [vmem:[%s4202_s1 + $0x20] sm:$0xff]   ;;  %v2916_v18 = vld [vmem:[%s4202_s1 + $0x28] sm:$0xff]  }
   0x7   :  { %652 = vmatpush1.bf16.msra.mxu1 %v2903_v5  ;;  %v2917_v19 = vld [vmem:[%s4202_s1 + $0x70] sm:$0xff]   ;;  %v2920_v22 = vld [vmem:[%s4202_s1 + $0x78] sm:$0xff]   ;;  %v2926_v27 = vld [vmem:[%s4202_s1 + $0xc0] ss:$0 sps:$4 sm:$0xff]  }
   0x8   :  { %2682 = vmatpush3.bf16.msra.mxu0 %v2904_v6  ;;  %653 = vmatprep.subr.bf16.mxu1 %v3064_v0  ;;  %v2918_v20 = vld [vmem:[%s4202_s1 + $0xb0] sm:$0xff]   ;;  %v2921_v24 = vld [vmem:[%s4202_s1 + $0xb8] sm:$0xff]   ;;  %v527_v29 = vsel %vm525_vm1, %v2926_v27, 0  ;;  %v115_v41 = vld [vmem:[%s4204_s5] sm:$0xff]  ;;  %vm1261_vm1 = vcmask 1044224  }
   0x9   :  { %2683 = vmatprep.subr.bf16.mxu0 %v2905_v7  ;;  %v2919_v21 = vld [vmem:[%s4202_s1 + $0x30] sm:$0xff]   ;;  %v2929_v25 = vld [vmem:[%s4203_s0 + $0xc] ss:$16 sps:$4 sm:$0xff]   ;;  %v2927_v31 = vld [vmem:[%s4203_s0 + $0x8] ss:$16 sps:$4 sm:$0xff]   ;;  %792 = vperm.xlu0 %2897, %v115_v41  }
   0xa   :  { %v2925_v23 = vld [vmem:[%s4203_s0 + $0x4] ss:$16 sps:$4 sm:$0xff]   ;;  %v2922_v26 = vld [vmem:[%s4202_s1 + $0x38] sm:$0xff]   ;;  %2536 = vmatprep.mubr.msk.bf16.mxu1 %vm491_vm0, %v2929_v25  ;;  %v2923_v28 = vld [vmem:[%s4203_s0] ss:$16 sps:$4 sm:$0xff]  }
   0xb   :  { %654 = vmatpush1.bf16.msra.mxu1 %v2906_v8  ;;  %561 = vmatprep.mubr.bf16.mxu0 %v2925_v23  ;;  %v2930_v30 = vld [vmem:[%s4203_s0 + $0x24] ss:$16 sps:$4 sm:$0xff]   ;;  %v2933_v32 = vld [vmem:[%s4203_s0 + $0x2c] ss:$16 sps:$4 sm:$0xff]   ;;  %v2932_v33 = vld [vmem:[%s4203_s0 + $0x20] ss:$16 sps:$4 sm:$0xff]  }
   0xc   :  { %2684 = vmatpush3.bf16.msra.mxu0 %v2907_v9  ;;  %655 = vmatprep.subr.bf16.mxu1 %v3064_v0  ;;  %v2936_v34 = vld [vmem:[%s4203_s0 + $0x44] ss:$16 sps:$4 sm:$0xff]   ;;  %v2935_v35 = vld [vmem:[%s4203_s0 + $0x28] ss:$16 sps:$4 sm:$0xff]   ;;  %v2939_v36 = vld [vmem:[%s4203_s0 + $0x4c] ss:$16 sps:$4 sm:$0xff]  }
   0xd   :  { %2685 = vmatprep.subr.bf16.mxu0 %v2908_v10  ;;  %v2938_v37 = vld [vmem:[%s4203_s0 + $0x40] ss:$16 sps:$4 sm:$0xff]   ;;  %v2942_v38 = vld [vmem:[%s4203_s0 + $0x64] ss:$16 sps:$4 sm:$0xff]   ;;  %v2941_v39 = vld [vmem:[%s4203_s0 + $0x48] ss:$16 sps:$4 sm:$0xff]  }
   0xe   :  { %v2945_v40 = vld [vmem:[%s4203_s0 + $0x6c] ss:$16 sps:$4 sm:$0xff]   ;;  %v117_v42 = vld [vmem:[%s4204_s5 + $0x10] sm:$0xff]  ;;  %v2947_v47 = vld [vmem:[%s4203_s0 + $0x68] ss:$16 sps:$4 sm:$0xff]  }
   0xf   :  { %656 = vmatpush1.bf16.msra.mxu1 %v2909_v11  ;;  %802 = vperm.xlu1 %2898, %v117_v42   ;;  %v116_v43 = vld [vmem:[%s4204_s5 + $0x8] sm:$0xff]  ;;  %v118_v44 = vld [vmem:[%s4204_s5 + $0x18] sm:$0xff]  ;;  %v2944_v45 = vld [vmem:[%s4203_s0 + $0x60] ss:$16 sps:$4 sm:$0xff]  }
  0x10   :  { %2686 = vmatpush3.bf16.msra.mxu0 %v2910_v12  ;;  %657 = vmatprep.subr.bf16.mxu1 %v3064_v0  ;;  %v2948_v46 = vld [vmem:[%s4203_s0 + $0x84] ss:$16 sps:$4 sm:$0xff]   ;;  %v120_v49 = vld [vmem:[%s4204_s5 + $0x28] sm:$0xff]  ;;  %v122_v52 = vld [vmem:[%s4204_s5 + $0x38] sm:$0xff] }
  0x11   :  { %2687 = vmatprep.subr.bf16.mxu0 %v2911_v13  ;;  %797 = vperm.xlu0 %2897, %v116_v43   ;;  %v119_v48 = vld [vmem:[%s4204_s5 + $0x20] sm:$0xff]  ;;  %v2951_v50 = vld [vmem:[%s4203_s0 + $0x8c] ss:$16 sps:$4 sm:$0xff]   ;;  %v121_v51 = vld [vmem:[%s4204_s5 + $0x30] sm:$0xff] }
  0x12   :  { %v2950_v53 = vld [vmem:[%s4203_s0 + $0x80] ss:$16 sps:$4 sm:$0xff]   ;;  %v2954_v54 = vld [vmem:[%s4203_s0 + $0xa4] ss:$16 sps:$4 sm:$0xff]   ;;  %v2953_v55 = vld [vmem:[%s4203_s0 + $0x88] ss:$16 sps:$4 sm:$0xff]  }
  0x13   :  { %658 = vmatpush1.bf16.msra.mxu1 %v2912_v14  ;;  %807 = vperm.xlu1 %2898, %v118_v44   ;;  %v123_v56 = vld [vmem:[%s4204_s5 + $0x40] sm:$0xff]  ;;  %v124_v57 = vld [vmem:[%s4204_s5 + $0x48] sm:$0xff]  ;;  %v125_v59 = vld [vmem:[%s4204_s5 + $0x50] sm:$0xff] }
  0x14   :  { %2688 = vmatpush3.bf16.msra.mxu0 %v2913_v15  ;;  %659 = vmatprep.subr.bf16.mxu1 %v3064_v0  ;;  %v2957_v58 = vld [vmem:[%s4203_s0 + $0xac] ss:$16 sps:$4 sm:$0xff]   ;;  %v2956_v61 = vld [vmem:[%s4203_s0 + $0xa0] ss:$16 sps:$4 sm:$0xff]   ;;  %v2960_v62 = vld [vmem:[%s4203_s0 + $0xc4] ss:$16 sps:$4 sm:$0xff]  }
  0x15   :  { %2689 = vmatprep.subr.bf16.mxu0 %v2914_v16  ;;  %812 = vperm.xlu0 %2897, %v119_v48   ;;  %v126_v60 = vld [vmem:[%s4204_s5 + $0x58] sm:$0xff]  ;;  %v128_v1 = vld [vmem:[%s4204_s5 + $0x68] sm:$0xff]  ;;  %v129_v3 = vld [vmem:[%s4204_s5 + $0x70] sm:$0xff] }
  0x16   :  { %v2959_v63 = vld [vmem:[%s4203_s0 + $0xa8] ss:$16 sps:$4 sm:$0xff]   ;;  %v2963_v2 = vld [vmem:[%s4203_s0 + $0xcc] ss:$16 sps:$4 sm:$0xff]   ;;  %v2962_v5 = vld [vmem:[%s4203_s0 + $0xc0] ss:$16 sps:$4 sm:$0xff]  }
  0x17   :  { %660 = vmatpush1.bf16.msra.mxu1 %v2915_v17  ;;  %817 = vperm.xlu1 %2898, %v120_v49   ;;  %v130_v4 = vld [vmem:[%s4204_s5 + $0x78] sm:$0xff]  ;;  %v2966_v6 = vld [vmem:[%s4203_s0 + $0xe4] ss:$16 sps:$4 sm:$0xff]   ;;  %v132_v9 = vld [vmem:[%s4204_s5 + $0x88] sm:$0xff] }
  0x18   :  { %2690 = vmatpush3.bf16.msra.mxu0 %v2916_v18  ;;  %661 = vmatprep.subr.bf16.mxu1 %v3064_v0  ;;  %v2965_v7 = vld [vmem:[%s4203_s0 + $0xc8] ss:$16 sps:$4 sm:$0xff]   ;;  %v131_v8 = vld [vmem:[%s4204_s5 + $0x80] sm:$0xff]  ;;  %v2969_v10 = vld [vmem:[%s4203_s0 + $0xec] ss:$16 sps:$4 sm:$0xff]  }
  0x19   :  { %2691 = vmatprep.subr.bf16.mxu0 %v2917_v19  ;;  %822 = vperm.xlu0 %2897, %v121_v51   ;;  %v133_v11 = vld [vmem:[%s4204_s5 + $0x90] sm:$0xff]  ;;  %v134_v12 = vld [vmem:[%s4204_s5 + $0x98] sm:$0xff]  ;;  %v135_v16 = vld [vmem:[%s4204_s5 + $0xa0] sm:$0xff] }
  0x1a   :  { %v2968_v13 = vld [vmem:[%s4203_s0 + $0xe0] ss:$16 sps:$4 sm:$0xff]   ;;  %v2972_v14 = vld [vmem:[%s4203_s0 + $0x104] ss:$16 sps:$4 sm:$0xff]   ;;  %v2971_v15 = vld [vmem:[%s4203_s0 + $0xe8] ss:$16 sps:$4 sm:$0xff]  }
  0x1b   :  { %662 = vmatpush1.bf16.msra.mxu1 %v2918_v20  ;;  %827 = vperm.xlu1 %2898, %v122_v52   ;;  %v2975_v17 = vld [vmem:[%s4203_s0 + $0x10c] ss:$16 sps:$4 sm:$0xff]   ;;  %v2974_v18 = vld [vmem:[%s4203_s0 + $0x100] ss:$16 sps:$4 sm:$0xff]   ;;  %v2978_v19 = vld [vmem:[%s4203_s0 + $0x124] ss:$16 sps:$4 sm:$0xff]  }
  0x1c   :  { %2692 = vmatpush3.bf16.msra.mxu0 %v2919_v21  ;;  %663 = vmatprep.subr.bf16.mxu1 %v3064_v0  ;;  %v2977_v20 = vld [vmem:[%s4203_s0 + $0x108] ss:$16 sps:$4 sm:$0xff]   ;;  %v2981_v21 = vld [vmem:[%s4203_s0 + $0x12c] ss:$16 sps:$4 sm:$0xff]   ;;  %v2980_v23 = vld [vmem:[%s4203_s0 + $0x120] ss:$16 sps:$4 sm:$0xff]  }
  0x1d   :  { %2693 = vmatprep.subr.bf16.mxu0 %v2920_v22  ;;  %832 = vperm.xlu0 %2897, %v123_v56   ;;  %v64_v22 = vld [vmem:[%s4203_s0 + $0x140] sm:$0xff]  ;;  %v65_v25 = vld [vmem:[%s4203_s0 + $0x148] sm:$0xff]  ;;  %vm3847_vm9 = vmor %vm1181_vm5, %vm1182_vm6  ;;  %vm1653_vm5 = vcmask 523264   ;;  %vm1657_vm6 = vcmask 517120  }
  0x1e   :  { %v2510_v27 = vcombine.high %v65_v25, %v65_v25  ;;  %vm3899_vm12 = vmor %vm1211_vm7, %vm1212_vm8  ;;  %vm1709_vm7 = vcmask 516096   ;;  %vm1737_vm8 = vcmask 1040896  }
  0x1f   :  { %664 = vmatpush1.bf16.msra.mxu1 %v2921_v24  ;;  %837 = vperm.xlu1 %2898, %v124_v57   ;;  %v2508_v24 = vcombine.high %v64_v22, %v64_v22  ;;  %vm3930_vm13 = vmor %vm1241_vm10, %vm1242_vm11  ;;  %vm2362_vm10 = vcmask 254976  }
  0x20   :  { %2694 = vmatpush3.bf16.msra.mxu0 %v2922_v26  ;;  %665 = vmatprep.subr.bf16.mxu1 %v3064_v0  ;;  %v127_v0 = vld [vmem:[%s4204_s5 + $0x60] sm:$0xff]  ;;  %v2983_v26 = vld [vmem:[%s4203_s0 + $0x128] ss:$16 sps:$4 sm:$0xff]  }
  0x21   :  { %842 = vperm.xlu0 %2897, %v125_v59  }
  0x23   :  { %562 = vmatmul.mubr.bf16.vlgmr.msra.gmra.mrb[0].mxu0 %v2923_v28  ;;  %666 = vmatpush1.bf16.msra.mxu1 %v527_v29  ;;  %v2507_v28 = vcombine.low %v64_v22, %v64_v22  ;;  %v2509_v29 = vcombine.low %v65_v25, %v65_v25 }
  0x24   :  { %569 = vmatprep.mubr.bf16.mxu0 %v2930_v30  ;;  %847 = vperm.xlu1 %2898, %v126_v60  }
  0x25   :  { %852 = vperm.xlu0 %2897, %v127_v0  }
  0x26   :  { %682 = vmatmul.mubr.bf16.vlgmr.msra.gmra.mrb[0].mxu1 %v2927_v31 }
  0x27   :  { %2537 = vmatprep.mubr.msk.bf16.mxu1 %vm491_vm0, %v2933_v32  ;;  %v3395_v32 = vld [vmem:[%s4205_s4] ss:$0 sm:$0xff] }
  0x28   :  { %857 = vperm.xlu1 %2898, %v128_v1  }
  0x29   :  { %862 = vperm.xlu0 %2897, %v129_v3  }
  0x2b   :  { %570 = vmatmul.mubr.bf16.gmra.mrb[4].mxu0 %v2932_v33 }
  0x2c   :  { %577 = vmatprep.mubr.bf16.mxu0 %v2936_v34  ;;  %867 = vperm.xlu1 %2898, %v130_v4  }
  0x2d   :  { %872 = vperm.xlu0 %2897, %v131_v8  }
  0x2e   :  { %690 = vmatmul.mubr.bf16.gmra.mrb[4].mxu1 %v2935_v35 }
  0x2f   :  { %2538 = vmatprep.mubr.msk.bf16.mxu1 %vm491_vm0, %v2939_v36 }
  0x30   :  { %877 = vperm.xlu1 %2898, %v132_v9  }
  0x31   :  { %882 = vperm.xlu0 %2897, %v133_v11  }
  0x33   :  { %578 = vmatmul.mubr.bf16.gmra.mrb[8].mxu0 %v2938_v37 }
  0x34   :  { %585 = vmatprep.mubr.bf16.mxu0 %v2942_v38  ;;  %887 = vperm.xlu1 %2898, %v134_v12  }
  0x35   :  { %892 = vperm.xlu0 %2897, %v135_v16  }
  0x36   :  { %698 = vmatmul.mubr.bf16.gmra.mrb[8].mxu1 %v2941_v39 }
  0x37   :  { %2539 = vmatprep.mubr.msk.bf16.mxu1 %vm491_vm0, %v2945_v40 }
  0x3b   :  { %586 = vmatmul.mubr.bf16.gmra.mrb[12].mxu0 %v2944_v45 }
  0x3c   :  { %593 = vmatprep.mubr.bf16.mxu0 %v2948_v46 }
  0x3e   :  { %706 = vmatmul.mubr.bf16.gmra.mrb[12].mxu1 %v2947_v47 }
  0x3f   :  { %2540 = vmatprep.mubr.msk.bf16.mxu1 %vm491_vm0, %v2951_v50 }
  0x43   :  { %594 = vmatmul.mubr.bf16.gmra.mrb[16].mxu0 %v2950_v53 }
  0x44   :  { %601 = vmatprep.mubr.bf16.mxu0 %v2954_v54 }
  0x46   :  { %714 = vmatmul.mubr.bf16.gmra.mrb[16].mxu1 %v2953_v55 }
  0x47   :  { %2541 = vmatprep.mubr.msk.bf16.mxu1 %vm491_vm0, %v2957_v58 }
  0x4b   :  { %602 = vmatmul.mubr.bf16.gmra.mrb[20].mxu0 %v2956_v61 }
  0x4c   :  { %609 = vmatprep.mubr.bf16.mxu0 %v2960_v62 }
  0x4e   :  { %722 = vmatmul.mubr.bf16.gmra.mrb[20].mxu1 %v2959_v63 }
  0x4f   :  { %2542 = vmatprep.mubr.msk.bf16.mxu1 %vm491_vm0, %v2963_v2 }
  0x53   :  { %610 = vmatmul.mubr.bf16.gmra.mrb[24].mxu0 %v2962_v5 }
  0x54   :  { %617 = vmatprep.mubr.bf16.mxu0 %v2966_v6 }
  0x56   :  { %730 = vmatmul.mubr.bf16.gmra.mrb[24].mxu1 %v2965_v7 }
  0x57   :  { %2543 = vmatprep.mubr.msk.bf16.mxu1 %vm491_vm0, %v2969_v10 }
  0x5b   :  { %618 = vmatmul.mubr.bf16.gmra.mrb[28].mxu0 %v2968_v13 }
  0x5c   :  { %625 = vmatprep.mubr.bf16.mxu0 %v2972_v14 }
  0x5e   :  { %738 = vmatmul.mubr.bf16.gmra.mrb[28].mxu1 %v2971_v15 }
  0x5f   :  { %2544 = vmatprep.mubr.msk.bf16.mxu1 %vm491_vm0, %v2975_v17 }
  0x63   :  { %626 = vmatmul.mubr.bf16.gmra.mrb[32].mxu0 %v2974_v18 }
  0x64   :  { %633 = vmatprep.mubr.bf16.mxu0 %v2978_v19 }
  0x66   :  { %746 = vmatmul.mubr.bf16.gmra.mrb[32].mxu1 %v2977_v20 }
  0x67   :  { %2545 = vmatprep.mubr.msk.bf16.mxu1 %vm491_vm0, %v2981_v21 }
  0x6b   :  { %634 = vmatmul.mubr.bf16.gmra.mrb[36].mxu0 %v2980_v23 }
  0x6c   :  { %641 = vmatprep.mubr.bf16.mxu0 %v2508_v24 }
  0x6e   :  { %754 = vmatmul.mubr.bf16.gmra.mrb[36].mxu1 %v2983_v26 }
  0x6f   :  { %2546 = vmatprep.mubr.msk.bf16.mxu1 %vm491_vm0, %v2510_v27  ;;  %vm1231_vm0 = vcmask 781824  }
  0x73   :  { %642 = vmatmul.mubr.bf16.gmra.mrb[40].mxu0 %v2507_v28 }
  0x76   :  { %762 = vmatmul.mubr.bf16.gmra.mrb[40].mxu1 %v2509_v29 }
  0x88   :  { %v3397_v35 = vpop.permute.xlu0 %792 }
  0x8e   :  { %v3412_v54 = vpop.permute.xlu1 %802 }
  0x90   :  { %v3406_v49 = vpop.permute.xlu0 %797 }
  0x92   :  { %v3426_v8 = vpop.permute.xlu1 %807 }
  0xf6   :  { %v2695_v30 = vpop.f32.mrb[0].mxu0 }
  0xf7   :  { %v2696_v31 = vpop.f32.mrb[1].mxu0 }
  0xf8   :  { %v2697_v33 = vadd.f32 %v2696_v31, %v2695_v30  ;;  %v2698_v34 = vpop.f32.mrb[2].mxu0  ;;  %v3444_v30 = vpop.permute.xlu0 %812 }
  0xf9   :  { %v2699_v36 = vpop.f32.mrb[3].mxu0  ;;  %v683_v37 = vpop.f32.mrb[0].mxu1 }
  0xfa   :  { %v2700_v38 = vadd.f32 %v2699_v36, %v2698_v34  ;;  %v564_v39 = vadd.f32 %v2697_v33, %v3395_v32  ;;  %v685_v40 = vpop.f32.mrb[1].mxu1  ;;  %v3450_v36 = vpop.permute.xlu1 %817 }
  0xfb   :  { %v686_v41 = vpop.f32.mrb[2].mxu1 }
  0xfc   :  { %v3400_v42 = vadd.f32 %v683_v37, %v564_v39  ;;  %v567_v43 = vadd.f32 %v2700_v38, %v3395_v32  ;;  %v688_v44 = vpop.f32.mrb[3].mxu1 }
  0xfe   :  { %v769_v45 = vmax.f32 %v3400_v42, 0.0  ;;  %v3404_v46 = vadd.f32 %v686_v41, %v567_v43  ;;  %v2701_v47 = vpop.f32.mrb[4].mxu0 }
  0xff   :  { %v2702_v48 = vpop.f32.mrb[5].mxu0 }
 0x100   :  { %v770_v50 = vmax.f32 %v3404_v46, 0.0  ;;  %v895_v51 = vmul.f32 %v3397_v35, %v769_v45  ;;  %v2703_v52 = vadd.f32 %v2702_v48, %v2701_v47  ;;  %v2704_v53 = vpop.f32.mrb[6].mxu0 }
 0x101   :  { %v2705_v55 = vpop.f32.mrb[7].mxu0  ;;  %v691_v56 = vpop.f32.mrb[4].mxu1 }
 0x102   :  { %v896_v57 = vmul.f32 %v3406_v49, %v770_v50  ;;  %v2706_v58 = vadd.f32 %v2705_v55, %v2704_v53  ;;  %v572_v59 = vadd.f32 %v2703_v52, %v3395_v32  ;;  %v693_v60 = vpop.f32.mrb[5].mxu1  ;;  %v917_v62 = vsel %vm916_vm2, %v895_v51, 0.0 }
 0x103   :  { %v694_v61 = vpop.f32.mrb[6].mxu1 }
 0x104   :  { %v918_v63 = vsel %vm916_vm2, %v896_v57, 0.0  ;;  %v3420_v0 = vadd.f32 %v691_v56, %v572_v59  ;;  %v575_v1 = vadd.f32 %v2706_v58, %v3395_v32  ;;  %v696_v2 = vpop.f32.mrb[7].mxu1 }
 0x105   :  { %v919_v3 = vadd.f32 %v918_v63, %v917_v62  ;;  %v3464_v62 = vpop.permute.xlu0 %822 }
 0x106   :  { %v4224_v4 = vmax.f32 %v3420_v0, 0.0  ;;  %v3424_v5 = vadd.f32 %v694_v61, %v575_v1  ;;  %v2707_v6 = vpop.f32.mrb[8].mxu0  ;;  %v3466_v1 = vpop.permute.xlu1 %827 }
 0x107   :  { %v2708_v7 = vpop.f32.mrb[9].mxu0 }
 0x108   :  { %v4223_v9 = vmax.f32 %v3424_v5, 0.0  ;;  %v897_v10 = vmul.f32 %v3412_v54, %v4224_v4  ;;  %v2709_v11 = vadd.f32 %v2708_v7, %v2707_v6  ;;  %v2710_v12 = vpop.f32.mrb[10].mxu0 }
 0x109   :  { %v2711_v13 = vpop.f32.mrb[11].mxu0  ;;  %v699_v14 = vpop.f32.mrb[8].mxu1 }
 0x10a   :  { %v920_v15 = vsel %vm916_vm2, %v897_v10, 0.0  ;;  %v898_v16 = vmul.f32 %v3426_v8, %v4223_v9  ;;  %v2712_v17 = vadd.f32 %v2711_v13, %v2710_v12  ;;  %v580_v18 = vadd.f32 %v2709_v11, %v3395_v32  ;;  %v701_v19 = vpop.f32.mrb[9].mxu1 }
 0x10b   :  { %v921_v20 = vadd.f32 %v920_v15, %v919_v3  ;;  %v702_v21 = vpop.f32.mrb[10].mxu1 }
 0x10c   :  { %v922_v22 = vsel %vm916_vm2, %v898_v16, 0.0  ;;  %v3438_v23 = vadd.f32 %v699_v14, %v580_v18  ;;  %v583_v24 = vadd.f32 %v2712_v17, %v3395_v32  ;;  %v704_v25 = vpop.f32.mrb[11].mxu1 }
 0x10d   :  { %v923_v26 = vadd.f32 %v922_v22, %v921_v20 }
 0x10e   :  { %v4221_v27 = vmax.f32 %v3438_v23, 0.0  ;;  %v3442_v28 = vadd.f32 %v702_v21, %v583_v24  ;;  %v2713_v29 = vpop.f32.mrb[12].mxu0 }
 0x10f   :  { %v2714_v31 = vpop.f32.mrb[13].mxu0 }
 0x110   :  { %v899_v33 = vmul.f32 %v3444_v30, %v4221_v27  ;;  %v4220_v34 = vmax.f32 %v3442_v28, 0.0  ;;  %v2715_v37 = vadd.f32 %v2714_v31, %v2713_v29  ;;  %v2716_v38 = vpop.f32.mrb[14].mxu0  ;;  %v3484_v31 = vpop.permute.xlu0 %832  ;;  %v4228_v42 = vmax.f32 %v3442_v28, 0.0  ;;  %v2994_v28 = vld [vmem:[%s4206_s2 + $0x48] sm:$0xff]  }
 0x111   :  { %v2717_v39 = vpop.f32.mrb[15].mxu0  ;;  %v707_v40 = vpop.f32.mrb[12].mxu1 }
 0x112   :  { %v924_v41 = vsel %vm916_vm2, %v899_v33, 0.0  ;;  %v900_v43 = vmul.f32 %v3450_v36, %v4220_v34  ;;  %v2718_v44 = vadd.f32 %v2717_v39, %v2716_v38  ;;  %v588_v47 = vadd.f32 %v2715_v37, %v3395_v32  ;;  %v709_v48 = vpop.f32.mrb[13].mxu1  ;;  %v3486_v37 = vpop.permute.xlu1 %837 }
 0x113   :  { %v925_v51 = vadd.f32 %v924_v41, %v923_v26  ;;  %v710_v52 = vpop.f32.mrb[14].mxu1 }
 0x114   :  { %v926_v53 = vsel %vm916_vm2, %v900_v43, 0.0  ;;  %v3458_v55 = vadd.f32 %v707_v40, %v588_v47  ;;  %v591_v56 = vadd.f32 %v2718_v44, %v3395_v32  ;;  %v712_v57 = vpop.f32.mrb[15].mxu1 }
 0x115   :  { %v927_v58 = vadd.f32 %v926_v53, %v925_v51 }
 0x116   :  { %v4219_v59 = vmax.f32 %v3458_v55, 0.0  ;;  %v3462_v60 = vadd.f32 %v710_v52, %v591_v56  ;;  %v2719_v61 = vpop.f32.mrb[16].mxu0  ;;  %v4229_v46 = vmax.f32 %v3458_v55, 0.0 }
 0x117   :  { %v2720_v63 = vpop.f32.mrb[17].mxu0 }
 0x118   :  { %v901_v2 = vmul.f32 %v3464_v62, %v4219_v59  ;;  %v4218_v3 = vmax.f32 %v3462_v60, 0.0  ;;  %v2721_v6 = vadd.f32 %v2720_v63, %v2719_v61  ;;  %v2722_v7 = vpop.f32.mrb[18].mxu0 }
 0x119   :  { %v2723_v10 = vpop.f32.mrb[19].mxu0  ;;  %v715_v11 = vpop.f32.mrb[16].mxu1 }
 0x11a   :  { %v928_v12 = vsel %vm916_vm2, %v901_v2, 0.0  ;;  %v902_v13 = vmul.f32 %v3466_v1, %v4218_v3  ;;  %v2724_v14 = vadd.f32 %v2723_v10, %v2722_v7  ;;  %v596_v15 = vadd.f32 %v2721_v6, %v3395_v32  ;;  %v717_v16 = vpop.f32.mrb[17].mxu1 }
 0x11b   :  { %v929_v17 = vadd.f32 %v928_v12, %v927_v58  ;;  %v718_v18 = vpop.f32.mrb[18].mxu1  ;;  %v3504_v12 = vpop.permute.xlu0 %842 }
 0x11c   :  { %v930_v19 = vsel %vm916_vm2, %v902_v13, 0.0  ;;  %v3478_v20 = vadd.f32 %v715_v11, %v596_v15  ;;  %v599_v21 = vadd.f32 %v2724_v14, %v3395_v32  ;;  %v720_v22 = vpop.f32.mrb[19].mxu1  ;;  %v3506_v14 = vpop.permute.xlu1 %847 }
 0x11d   :  { %v931_v24 = vadd.f32 %v930_v19, %v929_v17 }
 0x11e   :  { %v4217_v25 = vmax.f32 %v3478_v20, 0.0  ;;  %v3482_v26 = vadd.f32 %v718_v18, %v599_v21  ;;  %v2725_v29 = vpop.f32.mrb[20].mxu0  ;;  %v4231_v55 = vmax.f32 %v3478_v20, 0.0 }
 0x11f   :  { %v2726_v33 = vpop.f32.mrb[21].mxu0 }
 0x120   :  { %v903_v38 = vmul.f32 %v3484_v31, %v4217_v25  ;;  %v4216_v39 = vmax.f32 %v3482_v26, 0.0  ;;  %v2727_v40 = vadd.f32 %v2726_v33, %v2725_v29  ;;  %v2728_v41 = vpop.f32.mrb[22].mxu0 }
 0x121   :  { %v2729_v43 = vpop.f32.mrb[23].mxu0  ;;  %v723_v44 = vpop.f32.mrb[20].mxu1 }
 0x122   :  { %v932_v47 = vsel %vm916_vm2, %v903_v38, 0.0  ;;  %v904_v48 = vmul.f32 %v3486_v37, %v4216_v39  ;;  %v2730_v51 = vadd.f32 %v2729_v43, %v2728_v41  ;;  %v604_v52 = vadd.f32 %v2727_v40, %v3395_v32  ;;  %v725_v53 = vpop.f32.mrb[21].mxu1 }
 0x123   :  { %v933_v56 = vadd.f32 %v932_v47, %v931_v24  ;;  %v726_v57 = vpop.f32.mrb[22].mxu1 }
 0x124   :  { %v934_v58 = vsel %vm916_vm2, %v904_v48, 0.0  ;;  %v3498_v61 = vadd.f32 %v723_v44, %v604_v52  ;;  %v607_v63 = vadd.f32 %v2730_v51, %v3395_v32  ;;  %v728_v2 = vpop.f32.mrb[23].mxu1 }
 0x125   :  { %v935_v6 = vadd.f32 %v934_v58, %v933_v56 }
 0x126   :  { %v4215_v7 = vmax.f32 %v3498_v61, 0.0  ;;  %v3502_v10 = vadd.f32 %v726_v57, %v607_v63  ;;  %v2731_v11 = vpop.f32.mrb[24].mxu0  ;;  %v3524_v57 = vpop.permute.xlu0 %852 }
 0x127   :  { %v2732_v13 = vpop.f32.mrb[25].mxu0  ;;  %v3526_v63 = vpop.permute.xlu1 %857 }
 0x128   :  { %v905_v15 = vmul.f32 %v3504_v12, %v4215_v7  ;;  %v4214_v16 = vmax.f32 %v3502_v10, 0.0  ;;  %v2733_v17 = vadd.f32 %v2732_v13, %v2731_v11  ;;  %v2734_v18 = vpop.f32.mrb[26].mxu0 }
 0x129   :  { %v2735_v19 = vpop.f32.mrb[27].mxu0  ;;  %v731_v21 = vpop.f32.mrb[24].mxu1 }
 0x12a   :  { %v936_v22 = vsel %vm916_vm2, %v905_v15, 0.0  ;;  %v906_v24 = vmul.f32 %v3506_v14, %v4214_v16  ;;  %v2736_v29 = vadd.f32 %v2735_v19, %v2734_v18  ;;  %v612_v33 = vadd.f32 %v2733_v17, %v3395_v32  ;;  %v733_v38 = vpop.f32.mrb[25].mxu1 }
 0x12b   :  { %v937_v40 = vadd.f32 %v936_v22, %v935_v6  ;;  %v734_v41 = vpop.f32.mrb[26].mxu1 }
 0x12c   :  { %v938_v43 = vsel %vm916_vm2, %v906_v24, 0.0  ;;  %v3518_v44 = vadd.f32 %v731_v21, %v612_v33  ;;  %v615_v47 = vadd.f32 %v2736_v29, %v3395_v32  ;;  %v736_v48 = vpop.f32.mrb[27].mxu1 }
 0x12d   :  { %v939_v51 = vadd.f32 %v938_v43, %v937_v40 }
 0x12e   :  { %v4211_v52 = vmax.f32 %v3518_v44, 0.0  ;;  %v3522_v53 = vadd.f32 %v734_v41, %v615_v47  ;;  %v2737_v56 = vpop.f32.mrb[28].mxu0 }
 0x12f   :  { %v2738_v58 = vpop.f32.mrb[29].mxu0 }
 0x130   :  { %v907_v2 = vmul.f32 %v3524_v57, %v4211_v52  ;;  %v4210_v6 = vmax.f32 %v3522_v53, 0.0  ;;  %v2739_v11 = vadd.f32 %v2738_v58, %v2737_v56  ;;  %v2740_v13 = vpop.f32.mrb[30].mxu0  ;;  %v4236_v20 = vmax.f32 %v3522_v53, 0.0 }
 0x131   :  { %v2741_v15 = vpop.f32.mrb[31].mxu0  ;;  %v739_v17 = vpop.f32.mrb[28].mxu1 }
 0x132   :  { %v940_v18 = vsel %vm916_vm2, %v907_v2, 0.0  ;;  %v908_v19 = vmul.f32 %v3526_v63, %v4210_v6  ;;  %v2742_v21 = vadd.f32 %v2741_v15, %v2740_v13  ;;  %v620_v22 = vadd.f32 %v2739_v11, %v3395_v32  ;;  %v741_v24 = vpop.f32.mrb[29].mxu1  ;;  %v3544_v2 = vpop.permute.xlu0 %862 }
 0x133   :  { %v941_v29 = vadd.f32 %v940_v18, %v939_v51  ;;  %v742_v33 = vpop.f32.mrb[30].mxu1  ;;  %v3546_v11 = vpop.permute.xlu1 %867 }
 0x134   :  { %v942_v38 = vsel %vm916_vm2, %v908_v19, 0.0  ;;  %v3538_v40 = vadd.f32 %v739_v17, %v620_v22  ;;  %v623_v41 = vadd.f32 %v2742_v21, %v3395_v32  ;;  %v744_v43 = vpop.f32.mrb[31].mxu1 }
 0x135   :  { %v943_v47 = vadd.f32 %v942_v38, %v941_v29 }
 0x136   :  { %v4209_v48 = vmax.f32 %v3538_v40, 0.0  ;;  %v3542_v56 = vadd.f32 %v742_v33, %v623_v41  ;;  %v2743_v58 = vpop.f32.mrb[32].mxu0 }
 0x137   :  { %v2744_v13 = vpop.f32.mrb[33].mxu0 }
 0x138   :  { %v909_v51 = vmul.f32 %v3544_v2, %v4209_v48  ;;  %v4212_v15 = vmax.f32 %v3542_v56, 0.0  ;;  %v2745_v17 = vadd.f32 %v2744_v13, %v2743_v58  ;;  %v2746_v18 = vpop.f32.mrb[34].mxu0 }
 0x139   :  { %v2747_v19 = vpop.f32.mrb[35].mxu0  ;;  %v747_v21 = vpop.f32.mrb[32].mxu1 }
 0x13a   :  { %v944_v22 = vsel %vm916_vm2, %v909_v51, 0.0  ;;  %v910_v24 = vmul.f32 %v3546_v11, %v4212_v15  ;;  %v2748_v29 = vadd.f32 %v2747_v19, %v2746_v18  ;;  %v628_v33 = vadd.f32 %v2745_v17, %v3395_v32  ;;  %v749_v38 = vpop.f32.mrb[33].mxu1  ;;  %v2988_v51 = vld [vmem:[%s4206_s2 + $0x80] sm:$0xff]   ;;  %v3567_v19 = vpop.permute.xlu0 %872 }
 0x13b   :  { %v945_v41 = vadd.f32 %v944_v22, %v943_v47  ;;  %v750_v43 = vpop.f32.mrb[34].mxu1  ;;  %2850 = vmatprep.subr.bf16.mxu1 %v2988_v51  ;;  %v3569_v22 = vpop.permute.xlu1 %877 }
 0x13c   :  { %v946_v48 = vsel %vm916_vm2, %v910_v24, 0.0  ;;  %v3558_v6 = vadd.f32 %v747_v21, %v628_v33  ;;  %v631_v58 = vadd.f32 %v2748_v29, %v3395_v32  ;;  %v752_v13 = vpop.f32.mrb[35].mxu1  ;;  %2851 = vmatpush3.bf16.msra.mxu1 %v2988_v51  ;;  %v2989_v33 = vld [vmem:[%s4206_s2 + $0x88] sm:$0xff]  }
 0x13d   :  { %v947_v52 = vadd.f32 %v946_v48, %v945_v41  ;;  %2852 = vmatprep.subr.bf16.mxu1 %v2989_v33 }
 0x13e   :  { %v4213_v15 = vmax.f32 %v3558_v6, 0.0  ;;  %v3565_v18 = vadd.f32 %v750_v43, %v631_v58  ;;  %v2749_v17 = vpop.f32.mrb[36].mxu0  ;;  %v3585_v27 = vpop.permute.xlu0 %882 }
 0x13f   :  { %v2750_v47 = vpop.f32.mrb[37].mxu0 }
 0x140   :  { %v911_v21 = vmul.f32 %v3567_v19, %v4213_v15  ;;  %v4222_v48 = vmax.f32 %v3565_v18, 0.0  ;;  %v2751_v24 = vadd.f32 %v2750_v47, %v2749_v17  ;;  %v2752_v29 = vpop.f32.mrb[38].mxu0  ;;  %2853 = vmatpush3.bf16.msra.mxu1 %v2989_v33  ;;  %v4240_v53 = vmax.f32 %v3565_v18, 0.0 }
 0x141   :  { %v2753_v38 = vpop.f32.mrb[39].mxu0  ;;  %v755_v41 = vpop.f32.mrb[36].mxu1 }
 0x142   :  { %v948_v43 = vsel %vm916_vm2, %v911_v21, 0.0  ;;  %v912_v58 = vmul.f32 %v3569_v22, %v4222_v48  ;;  %v2754_v13 = vadd.f32 %v2753_v38, %v2752_v29  ;;  %v636_v15 = vadd.f32 %v2751_v24, %v3395_v32  ;;  %v757_v16 = vpop.f32.mrb[37].mxu1  ;;  %v3587_v38 = vpop.permute.xlu1 %887 }
 0x143   :  { %v949_v17 = vadd.f32 %v948_v43, %v947_v52  ;;  %v758_v47 = vpop.f32.mrb[38].mxu1 }
 0x144   :  { %v950_v51 = vsel %vm916_vm2, %v912_v58, 0.0  ;;  %v756_v7 = vadd.f32 %v755_v41, %v636_v15  ;;  %v639_v39 = vadd.f32 %v2754_v13, %v3395_v32  ;;  %v760_v25 = vpop.f32.mrb[39].mxu1 }
 0x145   :  { %v951_v3 = vadd.f32 %v950_v51, %v949_v17 }
 0x146   :  { %v787_v21 = vmax.f32 %v756_v7, 0.0  ;;  %v759_v59 = vadd.f32 %v758_v47, %v639_v39  ;;  %v2755_v34 = vpop.f32.mrb[40].mxu0 }
 0x147   :  { %v2756_v29 = vpop.f32.mrb[41].mxu0 }
 0x148   :  { %v913_v16 = vmul.f32 %v3585_v27, %v787_v21  ;;  %v788_v52 = vmax.f32 %v759_v59, 0.0  ;;  %v2757_v24 = vadd.f32 %v2756_v29, %v2755_v34  ;;  %v2758_v43 = vpop.f32.mrb[42].mxu0  ;;  %v3594_v59 = vpop.permute.xlu0 %892 }
 0x149   :  { %v2759_v58 = vpop.f32.mrb[43].mxu0  ;;  %v763_v15 = vpop.f32.mrb[40].mxu1 }
 0x14a   :  { %v952_v41 = vsel %vm916_vm2, %v913_v16, 0.0  ;;  %v914_v25 = vmul.f32 %v3587_v38, %v788_v52  ;;  %v644_v7 = vadd.f32 %v2757_v24, %v3395_v32  ;;  %v765_v39 = vpop.f32.mrb[41].mxu1 }
 0x14b   :  { %v953_v33 = vadd.f32 %v952_v41, %v951_v3  ;;  %v766_v13 = vpop.f32.mrb[42].mxu1 }
 0x14c   :  { %v954_v17 = vsel %vm916_vm2, %v914_v25, 0.0  ;;  %v764_v47 = vadd.f32 %v763_v15, %v644_v7  ;;  %v767_v51 = vpop.f32.mrb[43].mxu1  ;;  %v4225_v25 = vmax.f32 %v3420_v0, 0.0  ;;  %v4230_v0 = vmax.f32 %v3462_v60, 0.0 }
 0x14d   :  { %v955_v48 = vadd.f32 %v954_v17, %v953_v33  ;;  %v4232_v60 = vmax.f32 %v3482_v26, 0.0  ;;  %v4233_v51 = vmax.f32 %v3498_v61, 0.0  ;;  %v4237_v26 = vmax.f32 %v3538_v40, 0.0 }
 0x14e   :  { %v789_v9 = vmax.f32 %v764_v47, 0.0  ;;  %v4238_v61 = vmax.f32 %v3542_v56, 0.0  ;;  %v2996_v56 = vld [vmem:[%s4206_s2 + $0x50] sm:$0xff]  }
 0x150   :  { %v915_v34 = vmul.f32 %v3594_v59, %v789_v9 }
 0x152   :  { %v956_v29 = vsel %vm916_vm2, %v915_v34, 0.0 }
 0x153   :  { %v957_v16 = vadd.f32 %v956_v29, %v955_v48  ;;  %v4226_v48 = vmax.f32 %v3424_v5, 0.0  ;;  %v2992_v5 = vld [vmem:[%s4206_s2 + $0x40] sm:$0xff]   ;;  %v4234_v29 = vmax.f32 %v3502_v10, 0.0  ;;  %v2995_v10 = vld [vmem:[%s4206_s2 + $0x8] sm:$0xff]  }
 0x154   :  { %2761 = vmatprep.subr.bf16.mxu0 %v2992_v5 }
 0x155   :  { %v958_v43 = vrot.slane %v957_v16, 4 }
 0x157   :  { %v959_v58 = vadd.f32 %v958_v43, %v957_v16  ;;  %v4235_v43 = vmax.f32 %v3518_v44, 0.0  ;;  %v4239_v44 = vmax.f32 %v3558_v6, 0.0  ;;  %v2997_v6 = vld [vmem:[%s4206_s2 + $0x10] sm:$0xff]  }
 0x159   :  { %v960_v4 = vrot.slane %v959_v58, 2 }
 0x15b   :  { %v961_v32 = vadd.f32 %v960_v4, %v959_v58  ;;  %v4227_v4 = vmax.f32 %v3438_v23, 0.0  ;;  %v2993_v23 = vld [vmem:[%s4206_s2] sm:$0xff]  }
 0x15c   :  { %2762 = vmatpush3.bf16.msra.mxu0 %v2993_v23  ;;  %v2999_v23 = vld [vmem:[%s4206_s2 + $0x18] sm:$0xff]  }
 0x15d   :  { %v962_v24 = vrot.slane %v961_v32, 1  ;;  %2763 = vmatprep.subr.bf16.mxu0 %v2994_v28  ;;  %v3000_v28 = vld [vmem:[%s4206_s2 + $0x60] sm:$0xff]  }
 0x15f   :  { %v963_v3 = vadd.f32 %v962_v24, %v961_v32 }
 0x160   :  { %2764 = vmatpush3.bf16.msra.mxu0 %v2995_v10 }
 0x161   :  { %v3600_v41 = vsub.f32 %v769_v45, %v963_v3  ;;  %v3604_v15 = vsub.f32 %v770_v50, %v963_v3  ;;  %v3608_v7 = vsub.f32 %v4225_v25, %v963_v3  ;;  %v3612_v39 = vsub.f32 %v4226_v48, %v963_v3  ;;  %2765 = vmatprep.subr.bf16.mxu0 %v2996_v56 }
 0x162   :  { %v3616_v33 = vsub.f32 %v4227_v4, %v963_v3  ;;  %v3620_v45 = vsub.f32 %v4228_v42, %v963_v3  ;;  %v3624_v50 = vsub.f32 %v4229_v46, %v963_v3  ;;  %v3628_v13 = vsub.f32 %v4230_v0, %v963_v3 }
 0x163   :  { %v3641_v17 = vsub.f32 %v4231_v55, %v963_v3  ;;  %v3645_v47 = vsub.f32 %v4232_v60, %v963_v3  ;;  %v3649_v34 = vsub.f32 %v4233_v51, %v963_v3  ;;  %v3653_v16 = vsub.f32 %v4234_v29, %v963_v3 }
 0x164   :  { %v3657_v58 = vsub.f32 %v4235_v43, %v963_v3  ;;  %v3661_v32 = vsub.f32 %v4236_v20, %v963_v3  ;;  %v3665_v24 = vsub.f32 %v4237_v26, %v963_v3  ;;  %v3669_v25 = vsub.f32 %v4238_v61, %v963_v3  ;;  %2766 = vmatpush3.bf16.msra.mxu0 %v2997_v6  ;;  %v3001_v43 = vld [vmem:[%s4206_s2 + $0x20] sm:$0xff]  }
 0x165   :  { %v3676_v48 = vsub.f32 %v4239_v44, %v963_v3  ;;  %v3680_v4 = vsub.f32 %v4240_v53, %v963_v3  ;;  %v3682_v40 = vsub.f32 %v787_v21, %v963_v3  ;;  %v3684_v42 = vsub.f32 %v788_v52, %v963_v3  ;;  %v2998_v21 = vld [vmem:[%s4206_s2 + $0x58] sm:$0xff]  }
 0x166   :  { %v3689_v46 = vsub.f32 %v789_v9, %v963_v3  ;;  %v985_v18 = vmul.f32 %v3600_v41, %v3600_v41  ;;  %v986_v52 = vmul.f32 %v3604_v15, %v3604_v15  ;;  %v987_v9 = vmul.f32 %v3608_v7, %v3608_v7  ;;  %2767 = vmatprep.subr.bf16.mxu0 %v2998_v21 }
 0x167   :  { %v988_v0 = vmul.f32 %v3612_v39, %v3612_v39  ;;  %v989_v55 = vmul.f32 %v3616_v33, %v3616_v33  ;;  %v991_v26 = vmul.f32 %v3624_v50, %v3624_v50  ;;  %v993_v6 = vmul.f32 %v3641_v17, %v3641_v17 }
 0x168   :  { %v1006_v3 = vmul.f32 %v985_v18, %v3397_v35  ;;  %v1007_v5 = vmul.f32 %v986_v52, %v3406_v49  ;;  %v1008_v35 = vmul.f32 %v987_v9, %v3412_v54  ;;  %v990_v49 = vmul.f32 %v3620_v45, %v3620_v45  ;;  %2768 = vmatpush3.bf16.msra.mxu0 %v2999_v23 }
 0x169   :  { %v1009_v51 = vmul.f32 %v988_v0, %v3426_v8  ;;  %2769 = vmatprep.subr.bf16.mxu0 %v3000_v28  ;;  %v1010_v54 = vmul.f32 %v989_v55, %v3444_v30  ;;  %v992_v8 = vmul.f32 %v3628_v13, %v3628_v13  ;;  %v1012_v18 = vmul.f32 %v991_v26, %v3464_v62 }
 0x16a   :  { %v1027_v60 = vsel %vm916_vm2, %v1006_v3, 0.0  ;;  %v1028_v29 = vsel %vm916_vm2, %v1007_v5, 0.0  ;;  %v1030_v61 = vsel %vm916_vm2, %v1008_v35, 0.0  ;;  %v1011_v44 = vmul.f32 %v990_v49, %v3450_v36 }
 0x16b   :  { %v1029_v20 = vadd.f32 %v1028_v29, %v1027_v60  ;;  %v1032_v53 = vsel %vm916_vm2, %v1009_v51, 0.0  ;;  %v1034_v21 = vsel %vm916_vm2, %v1010_v54, 0.0  ;;  %v994_v52 = vmul.f32 %v3645_v47, %v3645_v47 }
 0x16c   :  { %2770 = vmatpush3.bf16.msra.mxu0 %v3001_v43  ;;  %v1013_v9 = vmul.f32 %v992_v8, %v3466_v1  ;;  %v1036_v3 = vsel %vm916_vm2, %v1011_v44, 0.0  ;;  %v995_v0 = vmul.f32 %v3649_v34, %v3649_v34  ;;  %v1014_v5 = vmul.f32 %v993_v6, %v3484_v31 }
 0x16d   :  { %v1031_v10 = vadd.f32 %v1030_v61, %v1029_v20  ;;  %v1038_v23 = vsel %vm916_vm2, %v1012_v18, 0.0  ;;  %v996_v62 = vmul.f32 %v3653_v16, %v3653_v16  ;;  %v1015_v55 = vmul.f32 %v994_v52, %v3486_v37 }
 0x16e   :  { %v1040_v35 = vsel %vm916_vm2, %v1013_v9, 0.0  ;;  %v997_v1 = vmul.f32 %v3657_v58, %v3657_v58  ;;  %v1016_v49 = vmul.f32 %v995_v0, %v3504_v12  ;;  %v1042_v51 = vsel %vm916_vm2, %v1014_v5, 0.0 }
 0x16f   :  { %v1033_v56 = vadd.f32 %v1032_v53, %v1031_v10  ;;  %v998_v31 = vmul.f32 %v3661_v32, %v3661_v32  ;;  %v1017_v43 = vmul.f32 %v996_v62, %v3506_v14  ;;  %v1044_v20 = vsel %vm916_vm2, %v1015_v55, 0.0 }
 0x170   :  { %v999_v37 = vmul.f32 %v3665_v24, %v3665_v24  ;;  %v1018_v54 = vmul.f32 %v997_v1, %v3524_v57  ;;  %v1046_v61 = vsel %vm916_vm2, %v1016_v49, 0.0  ;;  %v1000_v12 = vmul.f32 %v3669_v25, %v3669_v25 }
 0x171   :  { %v1035_v30 = vadd.f32 %v1034_v21, %v1033_v56  ;;  %v1019_v8 = vmul.f32 %v998_v31, %v3526_v63  ;;  %v1048_v44 = vsel %vm916_vm2, %v1017_v43, 0.0  ;;  %v1001_v14 = vmul.f32 %v3676_v48, %v3676_v48 }
 0x172   :  { %v1020_v56 = vmul.f32 %v999_v37, %v3544_v2  ;;  %v1050_v6 = vsel %vm916_vm2, %v1018_v54, 0.0  ;;  %v1002_v57 = vmul.f32 %v3680_v4, %v3680_v4  ;;  %v1021_v21 = vmul.f32 %v1000_v12, %v3546_v11 }
 0x173   :  { %v1037_v36 = vadd.f32 %v1036_v3, %v1035_v30  ;;  %v1052_v30 = vsel %vm916_vm2, %v1019_v8, 0.0  ;;  %v1003_v63 = vmul.f32 %v3682_v40, %v3682_v40  ;;  %v1022_v9 = vmul.f32 %v1001_v14, %v3567_v19  ;;  %v3002_v14 = vld [vmem:[%s4206_s2 + $0x68] sm:$0xff]  }
 0x174   :  { %v1054_v3 = vsel %vm916_vm2, %v1020_v56, 0.0  ;;  %v1004_v2 = vmul.f32 %v3684_v42, %v3684_v42  ;;  %v1023_v0 = vmul.f32 %v1002_v57, %v3569_v22  ;;  %v1056_v5 = vsel %vm916_vm2, %v1021_v21, 0.0  ;;  %v3003_v56 = vld [vmem:[%s4206_s2 + $0x28] sm:$0xff]   ;;  %2771 = vmatprep.subr.bf16.mxu0 %v3002_v14 }
 0x175   :  { %v1039_v28 = vadd.f32 %v1038_v23, %v1037_v36  ;;  %v1005_v11 = vmul.f32 %v3689_v46, %v3689_v46  ;;  %v1058_v62 = vsel %vm916_vm2, %v1022_v9, 0.0  ;;  %2772 = vmatpush3.bf16.msra.mxu0 %v3003_v56 }
 0x176   :  { %v1025_v19 = vmul.f32 %v1004_v2, %v3587_v38 }
 0x177   :  { %v1041_v60 = vadd.f32 %v1040_v35, %v1039_v28  ;;  %v1024_v28 = vmul.f32 %v1003_v63, %v3585_v27  ;;  %v1060_v35 = vsel %vm916_vm2, %v1023_v0, 0.0  ;;  %v1026_v1 = vmul.f32 %v1005_v11, %v3594_v59  ;;  %v3795_v59 = vld [vmem:[%s4205_s4 + $0x1] ss:$0 sm:$0xff] }
 0x179   :  { %v1043_v29 = vadd.f32 %v1042_v51, %v1041_v60  ;;  %v1062_v22 = vsel %vm916_vm2, %v1024_v28, 0.0  ;;  %v1064_v51 = vsel %vm916_vm2, %v1025_v19, 0.0  ;;  %v1066_v31 = vsel %vm916_vm2, %v1026_v1, 0.0 }
 0x17b   :  { %v1045_v26 = vadd.f32 %v1044_v20, %v1043_v29 }
 0x17d   :  { %v1047_v10 = vadd.f32 %v1046_v61, %v1045_v26 }
 0x17f   :  { %v1049_v53 = vadd.f32 %v1048_v44, %v1047_v10 }
 0x181   :  { %v1051_v18 = vadd.f32 %v1050_v6, %v1049_v53 }
 0x183   :  { %v1053_v52 = vadd.f32 %v1052_v30, %v1051_v18 }
 0x185   :  { %v1055_v36 = vadd.f32 %v1054_v3, %v1053_v52 }
 0x187   :  { %v1057_v23 = vadd.f32 %v1056_v5, %v1055_v36 }
 0x189   :  { %v1059_v55 = vadd.f32 %v1058_v62, %v1057_v23 }
 0x18b   :  { %v1061_v60 = vadd.f32 %v1060_v35, %v1059_v55 }
 0x18d   :  { %v1063_v49 = vadd.f32 %v1062_v22, %v1061_v60 }
 0x18f   :  { %v1065_v29 = vadd.f32 %v1064_v51, %v1063_v49 }
 0x191   :  { %v1067_v43 = vadd.f32 %v1066_v31, %v1065_v29 }
 0x193   :  { %v1068_v27 = vrot.slane %v1067_v43, 4 }
 0x195   :  { %v1069_v20 = vadd.f32 %v1068_v27, %v1067_v43 }
 0x197   :  { %v1070_v26 = vrot.slane %v1069_v20, 2 }
 0x199   :  { %v1071_v37 = vadd.f32 %v1070_v26, %v1069_v20 }
 0x19b   :  { %v1072_v54 = vrot.slane %v1071_v37, 1 }
 0x19d   :  { %v1073_v38 = vadd.f32 %v1072_v54, %v1071_v37 }
 0x19f   :  { %v1074_v61 = vadd.f32 1e-05, %v1073_v38 }
 0x1a1   :  { %3056 = vrsqrt.f32 %v1074_v61 }
 0x1ab   :  { %v3790_v10 = vpop.eup %3056 }
 0x1ac   :  { %v1094_v12 = vmul.f32 %v3790_v10, %v3682_v40  ;;  %v1095_v8 = vmul.f32 %v3790_v10, %v3684_v42  ;;  %v1096_v44 = vmul.f32 %v3790_v10, %v3689_v46  ;;  %v1078_v53 = vmul.f32 %v3790_v10, %v3608_v7  ;;  %v3814_v40 = vld [vmem:[%s4205_s4 + $0x2] ss:$0 sm:$0xff] }
 0x1ad   :  { %v1079_v42 = vmul.f32 %v3790_v10, %v3612_v39  ;;  %v1089_v46 = vmul.f32 %v3790_v10, %v3661_v32  ;;  %v1087_v7 = vmul.f32 %v3790_v10, %v3653_v16  ;;  %v1088_v6 = vmul.f32 %v3790_v10, %v3657_v58 }
 0x1ae   :  { %v1120_v18 = vmul.f32 %v3795_v59, %v1094_v12  ;;  %v1121_v57 = vmul.f32 %v3795_v59, %v1095_v8  ;;  %v1122_v21 = vmul.f32 %v3795_v59, %v1096_v44  ;;  %v1104_v30 = vmul.f32 %v3795_v59, %v1078_v53 }
 0x1af   :  { %v1105_v39 = vmul.f32 %v3795_v59, %v1079_v42  ;;  %v1115_v52 = vmul.f32 %v3795_v59, %v1089_v46  ;;  %v1113_v32 = vmul.f32 %v3795_v59, %v1087_v7  ;;  %v1114_v16 = vmul.f32 %v3795_v59, %v1088_v6 }
 0x1b0   :  { %v1146_v58 = vadd.f32 %v3814_v40, %v1120_v18  ;;  %v1147_v63 = vadd.f32 %v3814_v40, %v1121_v57  ;;  %v1148_v9 = vadd.f32 %v3814_v40, %v1122_v21  ;;  %v1130_v3 = vadd.f32 %v3814_v40, %v1104_v30 }
 0x1b1   :  { %v1131_v36 = vadd.f32 %v3814_v40, %v1105_v39  ;;  %v1141_v2 = vadd.f32 %v3814_v40, %v1115_v52  ;;  %v1139_v0 = vadd.f32 %v3814_v40, %v1113_v32  ;;  %v1140_v5 = vadd.f32 %v3814_v40, %v1114_v16 }
 0x1b2   :  { %v2676_v23 = vpack.c.bf16 %v1146_v58, %v1146_v58  ;;  %v2677_v11 = vpack.c.bf16 %v1147_v63, %v1147_v63  ;;  %v2678_v28 = vpack.c.bf16 %v1148_v9, %v1148_v9  ;;  %v2660_v62 = vpack.c.bf16 %v1130_v3, %v1130_v3 }
 0x1b3   :  { %v2661_v55 = vpack.c.bf16 %v1131_v36, %v1131_v36  ;;  %v3840_v19 = vpack.c.bf16 %v1141_v2, %v1141_v2  ;;  %v2669_v35 = vpack.c.bf16 %v1139_v0, %v1139_v0  ;;  %v2670_v60 = vpack.c.bf16 %v1140_v5, %v1140_v5 }
 0x1b4   :  { %1365 = vst.msk [vmem:[#allocation2 + $0x8] sm:$0xf] %vm1171_vm3, %v2676_v23  ;;  %1366 = vst.msk [vmem:[#allocation2 + $0x14] sm:$0xf] %vm1171_vm3, %v2677_v11  ;;  %v2554_v22 = vrot.slane %v2660_v62, 9  ;;  %v1080_v49 = vmul.f32 %v3790_v10, %v3616_v33  ;;  %v1081_v51 = vmul.f32 %v3790_v10, %v3620_v45  ;;  %v1090_v29 = vmul.f32 %v3790_v10, %v3665_v24 }
 0x1b5   :  { %1367 = vst.msk [vmem:[#allocation2 + $0x20] sm:$0x1] %vm1174_vm4, %v2678_v28  ;;  %1175 = vst.msk [vmem:[#allocation2 + $0x18] sm:$0x1] %vm1174_vm4, %v2660_v62  ;;  %v1186_v31 = vrot.slane %v2661_v55, 5  ;;  %v1289_v43 = vrot.slane %v3840_v19, 5  ;;  %v1082_v14 = vmul.f32 %v3790_v10, %v3624_v50  ;;  %v1083_v56 = vmul.f32 %v3790_v10, %v3628_v13 }
 0x1b6   :  { %v2566_v27 = vrot.slane %v2669_v35, 9  ;;  %v1286_v20 = vrot.slane %v2670_v60, 5  ;;  %1278 = vst.msk [vmem:[#allocation2 + $0x1c] sm:$0x1] %vm1174_vm4, %v2669_v35  ;;  %v1106_v26 = vmul.f32 %v3795_v59, %v1080_v49  ;;  %v1107_v37 = vmul.f32 %v3795_v59, %v1081_v51  ;;  %v3004_v50 = vld [vmem:[%s4206_s2 + $0x70] sm:$0xff]  }
 0x1b7   :  { %v1116_v54 = vmul.f32 %v3795_v59, %v1090_v29  ;;  %v2569_v33 = vrot.slane %v3840_v19, 10  ;;  %v1187_v45 = vsel %vm3847_vm9, %v2554_v22, %v1186_v31  ;;  %v1291_v24 = vrot.slane %v1289_v43, 4  ;;  %v3005_v13 = vld [vmem:[%s4206_s2 + $0x30] sm:$0xff]   ;;  %2773 = vmatprep.subr.bf16.mxu0 %v3004_v50 }
 0x1b8   :  { %v1287_v38 = vsel %vm3847_vm9, %v2566_v27, %v1286_v20  ;;  %v1188_v61 = vrot.slane %v1186_v31, 4  ;;  %1192 = vrot.lane.b32.xlu1 %v1187_v45, %s3065_s29  ;;  %v1132_v12 = vadd.f32 %v3814_v40, %v1106_v26  ;;  %v1133_v8 = vadd.f32 %v3814_v40, %v1107_v37  ;;  %2774 = vmatpush3.bf16.msra.mxu0 %v3005_v13 }
 0x1b9   :  { %v1288_v44 = vrot.slane %v1286_v20, 4  ;;  %v1142_v53 = vadd.f32 %v3814_v40, %v1116_v54  ;;  %1296 = vrot.lane.b32.xlu0 %v1291_v24, %s3065_s29  ;;  %v1091_v42 = vmul.f32 %v3790_v10, %v3669_v25  ;;  %v1092_v46 = vmul.f32 %v3790_v10, %v3676_v48  ;;  %v3006_v54 = vld [vmem:[%s4206_s2 + $0x78] sm:$0xff]  }
 0x1ba   :  { %v3881_v7 = vpack.c.bf16 %v1132_v12, %v1132_v12  ;;  %v2663_v6 = vpack.c.bf16 %v1133_v8, %v1133_v8  ;;  %v1108_v25 = vmul.f32 %v3795_v59, %v1082_v14  ;;  %v1109_v48 = vmul.f32 %v3795_v59, %v1083_v56  ;;  %2775 = vmatprep.subr.bf16.mxu0 %v3006_v54  ;;  %v3015_v54 = vld [vmem:[%s4206_s2 + $0x150] sm:$0xff]  }
 0x1bb   :  { %v1290_v18 = vsel %vm3847_vm9, %v1288_v44, %v1289_v43  ;;  %v2672_v57 = vpack.c.bf16 %v1142_v53, %v1142_v53  ;;  %v2990_v21 = vld [vmem:[#allocation2 + $0x8] ss:$12 sps:$4 sm:$0xff]   ;;  %v1117_v30 = vmul.f32 %v3795_v59, %v1091_v42  ;;  %v1118_v39 = vmul.f32 %v3795_v59, %v1092_v46  ;;  %v3007_v44 = vld [vmem:[%s4206_s2 + $0x38] sm:$0xff]   ;;  %2815 = vmatprep.subr.bf16.mxu1 %v3015_v54 }
 0x1bc   :  { %1292 = vrot.lane.b32.xlu1 %v1287_v38, %s3065_s29  ;;  %v1189_v52 = vrot.slane %v3881_v7, 5  ;;  %v2991_v32 = vld [vmem:[#allocation2 + $0x20] ss:$0 sps:$4 sm:$0x11]   ;;  %v1084_v58 = vmul.f32 %v3790_v10, %v3641_v17  ;;  %2854 = vmatprep.mubr.msk.bf16.mxu1 %vm916_vm2, %v2990_v21  ;;  %v2557_v63 = vrot.slane %v3881_v7, 10  ;;  %v1216_v9 = vrot.slane %v2663_v6, 6 }
 0x1bd   :  { %v1311_v3 = vrot.slane %v2672_v57, 6  ;;  %v1134_v36 = vadd.f32 %v3814_v40, %v1108_v25  ;;  %2855 = vmatmul.mubr.msk.bf16.vlgmr.msra.gmra.mrb[44].mxu1 %vm916_vm2, %v2991_v32  ;;  %v1135_v0 = vadd.f32 %v3814_v40, %v1109_v48  ;;  %v1143_v17 = vadd.f32 %v3814_v40, %v1117_v30  ;;  %2776 = vmatpush3.bf16.msra.mxu0 %v3007_v44 }
 0x1be   :  { %v1190_v2 = vsel %vm3847_vm9, %v1188_v61, %v1189_v52  ;;  %v1144_v5 = vadd.f32 %v3814_v40, %v1118_v39  ;;  %v1217_v23 = vsel %vm3899_vm12, %v2557_v63, %v1216_v9  ;;  %v1093_v62 = vmul.f32 %v3790_v10, %v3680_v4 }
 0x1bf   :  { %1194 = vrot.lane.b32.xlu0 %v1190_v2, %s3065_s29  ;;  %v1312_v11 = vsel %vm3899_vm12, %v2569_v33, %v1311_v3  ;;  %v3921_v28 = vpack.c.bf16 %v1134_v36, %v1134_v36  ;;  %v2665_v55 = vpack.c.bf16 %v1135_v0, %v1135_v0  ;;  %v3926_v19 = vpack.c.bf16 %v1143_v17, %v1143_v17 }
 0x1c0   :  { %1222 = vrot.lane.b32.xlu1 %v1217_v23, %s3066_s9  ;;  %v1313_v35 = vrot.slane %v1311_v3, 4  ;;  %v2674_v60 = vpack.c.bf16 %v1144_v5, %v1144_v5  ;;  %v1218_v1 = vrot.slane %v1216_v9, 4  ;;  %v1110_v51 = vmul.f32 %v3795_v59, %v1084_v58 }
 0x1c1   :  { %v2560_v49 = vrot.slane %v3921_v28, 11  ;;  %v1076_v4 = vmul.f32 %v3790_v10, %v3600_v41  ;;  %v1246_v29 = vrot.slane %v2665_v55, 7  ;;  %v1314_v31 = vrot.slane %v3926_v19, 6 }
 0x1c2   :  { %v2572_v43 = vrot.slane %v3926_v19, 11  ;;  %v1336_v27 = vrot.slane %v2674_v60, 7  ;;  %v1219_v20 = vrot.slane %v3921_v28, 6  ;;  %v1136_v26 = vadd.f32 %v3814_v40, %v1110_v51 }
 0x1c3   :  { %1294 = vrot.lane.b32.xlu0 %v1290_v18, %s3065_s29  ;;  %v1119_v37 = vmul.f32 %v3795_v59, %v1093_v62  ;;  %v1315_v41 = vsel %vm3899_vm12, %v1313_v35, %v1314_v31  ;;  %v1247_v38 = vsel %vm3930_vm13, %v2560_v49, %v1246_v29  ;;  %v1102_v61 = vmul.f32 %v3795_v59, %v1076_v4 }
 0x1c4   :  { %1317 = vrot.lane.b32.xlu1 %v1312_v11, %s3066_s9  ;;  %v1337_v33 = vsel %vm3930_vm13, %v2572_v43, %v1336_v27  ;;  %v1220_v45 = vsel %vm3899_vm12, %v1218_v1, %v1219_v20  ;;  %v1085_v12 = vmul.f32 %v3790_v10, %v3645_v47  ;;  %v1077_v8 = vmul.f32 %v3790_v10, %v3604_v15 }
 0x1c5   :  { %v1145_v24 = vadd.f32 %v3814_v40, %v1119_v37  ;;  %v2666_v53 = vpack.c.bf16 %v1136_v26, %v1136_v26  ;;  %v1338_v56 = vrot.slane %v1336_v27, 4  ;;  %v1086_v42 = vmul.f32 %v3790_v10, %v3649_v34  ;;  %v3013_v26 = vld [vmem:[%s4206_s2 + $0xd0] sm:$0xff]  }
 0x1c6   :  { %v1128_v47 = vadd.f32 %v3814_v40, %v1102_v61  ;;  %v1111_v46 = vmul.f32 %v3795_v59, %v1085_v12  ;;  %v1103_v15 = vmul.f32 %v3795_v59, %v1077_v8  ;;  %v1248_v57 = vrot.slane %v1246_v29, 4  ;;  %v3014_v37 = vld [vmem:[%s4206_s2 + $0x90] sm:$0xff]   ;;  %2793 = vmatprep.subr.bf16.mxu0 %v3013_v26  ;;  %v3020_v61 = vld [vmem:[%s4206_s2 + $0xe0] sm:$0xff]  }
 0x1c7   :  { %1224 = vrot.lane.b32.xlu0 %v1220_v45, %s3066_s9  ;;  %v2675_v14 = vpack.c.bf16 %v1145_v24, %v1145_v24  ;;  %v1112_v18 = vmul.f32 %v3795_v59, %v1086_v42  ;;  %v1249_v25 = vrot.slane %v2666_v53, 7  ;;  %v1191_v32 = vrot.slane %v1189_v52, 4  ;;  %v3019_v45 = vld [vmem:[%s4206_s2 + $0x158] sm:$0xff]   ;;  %v3023_v12 = vld [vmem:[%s4206_s2 + $0x160] sm:$0xff]  }
 0x1c8   :  { %1252 = vrot.lane.b32.xlu1 %v1247_v38, %s3067_s13  ;;  %v2658_v50 = vpack.c.bf16 %v1128_v47, %v1128_v47  ;;  %v1137_v13 = vadd.f32 %v3814_v40, %v1111_v46  ;;  %v1129_v21 = vadd.f32 %v3814_v40, %v1103_v15  ;;  %v1316_v16 = vrot.slane %v1314_v31, 4  ;;  %v3018_v24 = vld [vmem:[%s4206_s2 + $0x98] sm:$0xff]   ;;  %v3022_v8 = vld [vmem:[%s4206_s2 + $0xa0] sm:$0xff]  }
 0x1c9   :  { %v1339_v6 = vrot.slane %v2675_v14, 7  ;;  %v1138_v10 = vadd.f32 %v3814_v40, %v1112_v18  ;;  %v1250_v39 = vsel %vm3930_vm13, %v1248_v57, %v1249_v25  ;;  %v1221_v40 = vrot.slane %v1219_v20, 4  ;;  %v3021_v38 = vld [vmem:[%s4206_s2 + $0x118] sm:$0xff]   ;;  %v2576_v53 = vld [vmem:[%s4205_s4 + $0x3] ss:$0 sm:$0xff] }
 0x1ca   :  { %1172 = vst.msk [vmem:[#allocation2] sm:$0xf] %vm1171_vm3, %v2658_v50  ;;  %v2667_v48 = vpack.c.bf16 %v1137_v13, %v1137_v13  ;;  %v2659_v59 = vpack.c.bf16 %v1129_v21, %v1129_v21  ;;  %v1251_v58 = vrot.slane %v1249_v25, 4  ;;  %vm1264_vm4 = vcmask 1041152  }
 0x1cb   :  { %1319 = vrot.lane.b32.xlu0 %v1315_v41, %s3066_s9  ;;  %v1340_v34 = vsel %vm3930_vm13, %v1338_v56, %v1339_v6  ;;  %v2668_v30 = vpack.c.bf16 %v1138_v10, %v1138_v10  ;;  %v1341_v7 = vrot.slane %v1339_v6, 4  ;;  %v3016_v41 = vld [vmem:[%s4206_s2 + $0xd8] sm:$0xff]   ;;  %v3068_v26 = vmov 1966171168  }
 0x1cc   :  { %1342 = vrot.lane.b32.xlu1 %v1337_v33, %s3067_s13  ;;  %1276 = vst.msk [vmem:[#allocation2 + $0x4] sm:$0xf] %vm1171_vm3, %v2667_v48  ;;  %1173 = vst.msk [vmem:[#allocation2 + $0xc] sm:$0xf] %vm1171_vm3, %v2659_v59  ;;  %v3017_v33 = vld [vmem:[%s4206_s2 + $0x110] sm:$0xff]   ;;  %vm3070_vm9 = vmmov 0  }
 0x1cd   :  { %1277 = vst.msk [vmem:[#allocation2 + $0x10] sm:$0xf] %vm1171_vm3, %v2668_v30  ;;  %vm1234_vm3 = vcmask 778752   ;;  %2816 = vmatpush3.bf16.msra.mxu1 %v3017_v33 }
 0x1ce   :  { %2817 = vmatprep.subr.bf16.mxu1 %v3019_v45 }
 0x1cf   :  { %1254 = vrot.lane.b32.xlu0 %v1250_v39, %s3067_s13 }
 0x1d0   :  { %1196 = vrot.lane.b32.xlu1 %v1191_v32, %s3065_s29 }
 0x1d1   :  { %2818 = vmatpush3.bf16.msra.mxu1 %v3021_v38 }
 0x1d2   :  { %2819 = vmatprep.subr.bf16.mxu1 %v3023_v12 }
 0x1d3   :  { %1344 = vrot.lane.b32.xlu0 %v1340_v34, %s3067_s13 }
 0x1d4   :  { %1226 = vrot.lane.b32.xlu1 %v1221_v40, %s3066_s9 }
 0x1d7   :  { %1321 = vrot.lane.b32.xlu0 %v1316_v16, %s3066_s9 }
 0x1d8   :  { %1256 = vrot.lane.b32.xlu1 %v1251_v58, %s3067_s13 }
 0x1db   :  { %1346 = vrot.lane.b32.xlu0 %v1341_v7, %s3067_s13 }
 0x22a   :  { %v1193_v52 = vpop.permute.xlu1 %1192 }
 0x22b   :  { %1202 = vst.msk [vmem:[#allocation2] sm:$0xf] %vm1201_vm14, %v1193_v52  ;;  %v1297_v63 = vpop.permute.xlu0 %1296 }
 0x22c   :  { %1303 = vst.msk [vmem:[#allocation2 + $0x1c] sm:$0x1] %vm1204_vm15, %v1297_v63 }
 0x22e   :  { %v1293_v9 = vpop.permute.xlu1 %1292 }
 0x22f   :  { %1301 = vst.msk [vmem:[#allocation2 + $0x4] sm:$0xf] %vm1201_vm14, %v1293_v9 }
 0x231   :  { %v1195_v3 = vpop.permute.xlu0 %1194 }
 0x232   :  { %1203 = vst.msk [vmem:[#allocation2 + $0xc] sm:$0xf] %vm1201_vm14, %v1195_v3  ;;  %v1223_v36 = vpop.permute.xlu1 %1222 }
 0x233   :  { %1232 = vst.msk [vmem:[#allocation2] sm:$0xf] %vm1231_vm0, %v1223_v36 }
 0x235   :  { %v1295_v2 = vpop.permute.xlu0 %1294 }
 0x236   :  { %1302 = vst.msk [vmem:[#allocation2 + $0x10] sm:$0xf] %vm1201_vm14, %v1295_v2  ;;  %v1318_v0 = vpop.permute.xlu1 %1317 }
 0x237   :  { %1326 = vst.msk [vmem:[#allocation2 + $0x4] sm:$0xf] %vm1231_vm0, %v1318_v0 }
 0x239   :  { %v1225_v17 = vpop.permute.xlu0 %1224 }
 0x23a   :  { %1233 = vst.msk [vmem:[#allocation2 + $0xc] sm:$0xf] %vm1231_vm0, %v1225_v17  ;;  %v1253_v5 = vpop.permute.xlu1 %1252 }
 0x23b   :  { %1262 = vst.msk [vmem:[#allocation2] sm:$0xf] %vm1261_vm1, %v1253_v5 }
 0x23d   :  { %v1320_v23 = vpop.permute.xlu0 %1319 }
 0x23e   :  { %1327 = vst.msk [vmem:[#allocation2 + $0x10] sm:$0xf] %vm1231_vm0, %v1320_v23  ;;  %v1343_v11 = vpop.permute.xlu1 %1342 }
 0x23f   :  { %1351 = vst.msk [vmem:[#allocation2 + $0x4] sm:$0xf] %vm1261_vm1, %v1343_v11 }
 0x241   :  { %v1255_v28 = vpop.permute.xlu0 %1254 }
 0x242   :  { %1263 = vst.msk [vmem:[#allocation2 + $0xc] sm:$0xf] %vm1261_vm1, %v1255_v28  ;;  %v1197_v62 = vpop.permute.xlu1 %1196 }
 0x243   :  { %1205 = vst.msk [vmem:[#allocation2 + $0x18] sm:$0x1] %vm1204_vm15, %v1197_v62 }
 0x245   :  { %v1345_v55 = vpop.permute.xlu0 %1344 }
 0x246   :  { %1352 = vst.msk [vmem:[#allocation2 + $0x10] sm:$0xf] %vm1261_vm1, %v1345_v55  ;;  %v1227_v19 = vpop.permute.xlu1 %1226 }
 0x247   :  { %1235 = vst.msk [vmem:[#allocation2 + $0x18] sm:$0x1] %vm1234_vm3, %v1227_v19 }
 0x249   :  { %v1322_v35 = vpop.permute.xlu0 %1321  ;;  %v3008_v22 = vld [vmem:[#allocation2] ss:$12 sps:$4 sm:$0xff]  }
 0x24a   :  { %1328 = vst.msk [vmem:[#allocation2 + $0x1c] sm:$0x1] %vm1234_vm3, %v1322_v35  ;;  %v1257_v60 = vpop.permute.xlu1 %1256 }
 0x24b   :  { %1265 = vst.msk [vmem:[#allocation2 + $0x18] sm:$0x1] %vm1264_vm4, %v1257_v60 }
 0x24d   :  { %v1347_v1 = vpop.permute.xlu0 %1346  ;;  %v3010_v49 = vld [vmem:[#allocation2 + $0x4] ss:$12 sps:$4 sm:$0xff]  }
 0x24e   :  { %1353 = vst.msk [vmem:[#allocation2 + $0x1c] sm:$0x1] %vm1264_vm4, %v1347_v1  ;;  %1586 = vmatprep.mubr.bf16.mxu0 %v3010_v49 }
 0x24f   :  { %1587 = vmatmul.mubr.bf16.vlgmr.msra.gmra.mrb[44].mxu0 %v3008_v22 }
 0x250   :  { %2794 = vmatpush3.bf16.msra.mxu0 %v3014_v37  ;;  %v1713_v37 = vunpack.c.l.s4 %v3068_v26 }
 0x251   :  { %2795 = vmatprep.subr.bf16.mxu0 %v3016_v41  ;;  %v2603_v41 = vld [vmem:[%s4205_s4 + $0x4] ss:$0 sm:$0xff] }
 0x252   :  { %v1714_v12 = vunpack.c.0.s8 %v1713_v37 }
 0x254   :  { %2796 = vmatpush3.bf16.msra.mxu0 %v3018_v24  ;;  %v2604_v24 = vld [vmem:[%s4205_s4 + $0x5] ss:$0 sm:$0xff] }
 0x255   :  { %v1372_v51 = vld [vmem:[#allocation2 + $0x18] sm:$0x11]  ;;  %2797 = vmatprep.subr.bf16.mxu0 %v3020_v61 }
 0x256   :  { %v2581_v4 = vcombine.high %v1372_v51, %v1372_v51  ;;  %v2580_v29 = vcombine.low %v1372_v51, %v1372_v51 }
 0x258   :  { %1594 = vmatprep.mubr.bf16.mxu0 %v2581_v4  ;;  %2798 = vmatpush3.bf16.msra.mxu0 %v3022_v8  ;;  %v3024_v8 = vld [vmem:[%s4206_s2 + $0xe8] sm:$0xff]  }
 0x259   :  { %1595 = vmatmul.mubr.bf16.gmra.mrb[48].mxu0 %v2580_v29  ;;  %2799 = vmatprep.subr.bf16.mxu0 %v3024_v8  ;;  %v3052_v8 = vld [vmem:[%s4207_s3 + $0x10] sm:$0xff]  }
 0x290   :  { %v2856_v31 = vpop.f32.mrb[44].mxu1 }
 0x291   :  { %v1636_v43 = vpop.f32.mrb[45].mxu1 }
 0x292   :  { %v2857_v27 = vpop.f32.mrb[46].mxu1 }
 0x293   :  { %v1639_v20 = vpop.f32.mrb[47].mxu1 }
 0x322   :  { %v2777_v44 = vpop.f32.mrb[44].mxu0 }
 0x323   :  { %v2778_v14 = vpop.f32.mrb[45].mxu0 }
 0x324   :  { %v2779_v56 = vadd.f32 %v2778_v14, %v2777_v44  ;;  %v2780_v42 = vpop.f32.mrb[46].mxu0  ;;  %v3025_v44 = vld [vmem:[%s4206_s2 + $0x120] sm:$0xff]  }
 0x325   :  { %v2781_v47 = vpop.f32.mrb[47].mxu0  ;;  %2820 = vmatpush3.bf16.msra.mxu1 %v3025_v44  ;;  %v3053_v44 = vld [vmem:[%s4207_s3 + $0x18] sm:$0xff]  }
 0x326   :  { %v1589_v46 = vadd.f32 %v2779_v56, %v2576_v53  ;;  %v2782_v15 = vadd.f32 %v2781_v47, %v2780_v42  ;;  %v3027_v47 = vld [vmem:[%s4206_s2 + $0x168] sm:$0xff]  }
 0x327   :  { %2821 = vmatprep.subr.bf16.mxu1 %v3027_v47 }
 0x328   :  { %v1637_v6 = vadd.f32 %v1636_v43, %v1589_v46  ;;  %v1592_v18 = vadd.f32 %v2782_v15, %v2576_v53 }
 0x32a   :  { %v1650_v57 = vmax.f32 %v1637_v6, 0.0  ;;  %v1640_v50 = vadd.f32 %v1639_v20, %v1592_v18  ;;  %v1715_v20 = vlaneseq }
 0x32c   :  { %v2783_v13 = vpop.f32.mrb[48].mxu0  ;;  %v1651_v21 = vmax.f32 %v1640_v50, 0.0  ;;  %v1654_v48 = vsel %vm1653_vm5, %v1650_v57, 0.0  ;;  %v1716_v33 = vshrl.u32 %v1715_v20, 7  ;;  %v3029_v50 = vld [vmem:[%s4206_s2 + $0x128] sm:$0xff]   ;;  %v3046_v20 = vld [vmem:[%s4206_s2 + $0x190] sm:$0xff]  }
 0x32d   :  { %v2784_v34 = vpop.f32.mrb[49].mxu0  ;;  %2822 = vmatpush3.bf16.msra.mxu1 %v3029_v50 }
 0x32e   :  { %v2785_v10 = vadd.f32 %v2784_v34, %v2783_v13  ;;  %v2786_v25 = vpop.f32.mrb[50].mxu0  ;;  %v1655_v59 = vsel %vm1653_vm5, %v1651_v21, 0.0  ;;  %v4057_v18 = vsub.s32 %v1714_v12, %v1716_v33  ;;  %v3030_v13 = vld [vmem:[%s4206_s2 + $0xb0] sm:$0xff]   ;;  %v3051_v12 = vld [vmem:[%s4207_s3 + $0x8] sm:$0xff]  }
 0x32f   :  { %v2787_v30 = vpop.f32.mrb[51].mxu0  ;;  %v1656_v39 = vadd.f32 %v1655_v59, %v1654_v48  ;;  %v3031_v25 = vld [vmem:[%s4206_s2 + $0x170] sm:$0xff]   ;;  %v3032_v48 = vld [vmem:[%s4206_s2 + $0xf8] sm:$0xff]  }
 0x330   :  { %v1597_v32 = vadd.f32 %v2785_v10, %v2576_v53  ;;  %v3026_v53 = vld [vmem:[%s4206_s2 + $0xa8] sm:$0xff]   ;;  %v3033_v59 = vld [vmem:[%s4206_s2 + $0x130] sm:$0xff]   ;;  %2823 = vmatprep.subr.bf16.mxu1 %v3031_v25 }
 0x331   :  { %2800 = vmatpush3.bf16.msra.mxu0 %v3026_v53  ;;  %2824 = vmatpush3.bf16.msra.mxu1 %v3033_v59 }
 0x332   :  { %v1645_v40 = vadd.f32 %v2856_v31, %v1597_v32  ;;  %v3034_v32 = vld [vmem:[%s4206_s2 + $0xb8] sm:$0xff]  }
 0x334   :  { %v1652_v16 = vmax.f32 %v1645_v40, 0.0  ;;  %v3035_v40 = vld [vmem:[%s4206_s2 + $0x178] sm:$0xff]  }
 0x335   :  { %2825 = vmatprep.subr.bf16.mxu1 %v3035_v40 }
 0x336   :  { %v1658_v58 = vsel %vm1657_vm6, %v1652_v16, 0.0 }
 0x337   :  { %v1659_v7 = vadd.f32 %v1658_v58, %v1656_v39 }
 0x339   :  { %v1660_v52 = vrot.slane %v1659_v7, 4 }
 0x33b   :  { %v1661_v63 = vadd.f32 %v1660_v52, %v1659_v7 }
 0x33d   :  { %v1662_v9 = vrot.slane %v1661_v63, 2 }
 0x33f   :  { %v1663_v3 = vadd.f32 %v1662_v9, %v1661_v63  ;;  %v3037_v9 = vld [vmem:[%s4206_s2 + $0x138] sm:$0xff]  }
 0x340   :  { %2826 = vmatpush3.bf16.msra.mxu1 %v3037_v9 }
 0x341   :  { %v1664_v36 = vrot.slane %v1663_v3, 1 }
 0x343   :  { %v1665_v2 = vadd.f32 %v1664_v36, %v1663_v3 }
 0x345   :  { %v1667_v0 = vmul.f32 0.055555556, %v1665_v2 }
 0x347   :  { %v1668_v17 = vsub.f32 %v1650_v57, %v1667_v0  ;;  %v1669_v5 = vsub.f32 %v1651_v21, %v1667_v0  ;;  %v1670_v23 = vsub.f32 %v1652_v16, %v1667_v0  ;;  %v3028_v57 = vld [vmem:[%s4206_s2 + $0xf0] sm:$0xff]   ;;  %v3036_v16 = vld [vmem:[%s4206_s2 + $0x100] sm:$0xff]  }
 0x348   :  { %2801 = vmatprep.subr.bf16.mxu0 %v3028_v57  ;;  %v3038_v0 = vld [vmem:[%s4206_s2 + $0xc0] sm:$0xff]  }
 0x349   :  { %v1671_v11 = vmul.f32 %v1668_v17, %v1668_v17  ;;  %v1672_v28 = vmul.f32 %v1669_v5, %v1669_v5  ;;  %v1673_v62 = vmul.f32 %v1670_v23, %v1670_v23  ;;  %2802 = vmatpush3.bf16.msra.mxu0 %v3030_v13 }
 0x34a   :  { %2803 = vmatprep.subr.bf16.mxu0 %v3032_v48 }
 0x34b   :  { %v1674_v55 = vsel %vm1653_vm5, %v1671_v11, 0.0  ;;  %v1675_v19 = vsel %vm1653_vm5, %v1672_v28, 0.0  ;;  %v1677_v60 = vsel %vm1657_vm6, %v1673_v62, 0.0  ;;  %v3041_v28 = vld [vmem:[%s4206_s2 + $0x140] sm:$0xff]   ;;  %v3042_v62 = vld [vmem:[%s4206_s2 + $0xc8] sm:$0xff]  }
 0x34c   :  { %v1676_v35 = vadd.f32 %v1675_v19, %v1674_v55  ;;  %v3043_v55 = vld [vmem:[%s4206_s2 + $0x188] sm:$0xff]  }
 0x34d   :  { %2804 = vmatpush3.bf16.msra.mxu0 %v3034_v32 }
 0x34e   :  { %v1678_v1 = vadd.f32 %v1677_v60, %v1676_v35  ;;  %2805 = vmatprep.subr.bf16.mxu0 %v3036_v16  ;;  %v3045_v35 = vld [vmem:[%s4206_s2 + $0x148] sm:$0xff]   ;;  %v3069_v60 = vmov 0.0  }
 0x350   :  { %v1679_v22 = vrot.slane %v1678_v1, 4 }
 0x351   :  { %2806 = vmatpush3.bf16.msra.mxu0 %v3038_v0 }
 0x352   :  { %v1680_v49 = vadd.f32 %v1679_v22, %v1678_v1 }
 0x354   :  { %v1681_v51 = vrot.slane %v1680_v49, 2 }
 0x356   :  { %v1682_v4 = vadd.f32 %v1681_v51, %v1680_v49 }
 0x358   :  { %v1683_v29 = vrot.slane %v1682_v4, 1 }
 0x35a   :  { %v1684_v31 = vadd.f32 %v1683_v29, %v1682_v4 }
 0x35c   :  { %v1685_v43 = vmul.f32 0.055555556, %v1684_v31 }
 0x35e   :  { %v1686_v27 = vadd.f32 1e-05, %v1685_v43 }
 0x360   :  { %3058 = vrsqrt.f32 %v1686_v27 }
 0x36a   :  { %v3059_v54 = vpop.eup %3058 }
 0x36b   :  { %v1690_v45 = vmul.f32 %v3059_v54, %v1670_v23  ;;  %v1688_v38 = vmul.f32 %v3059_v54, %v1668_v17  ;;  %v1689_v61 = vmul.f32 %v3059_v54, %v1669_v5  ;;  %v3039_v17 = vld [vmem:[%s4206_s2 + $0x180] sm:$0xff]   ;;  %v3040_v5 = vld [vmem:[%s4206_s2 + $0x108] sm:$0xff]   ;;  %v3047_v54 = vld [vmem:[%s4206_s2 + $0x198] sm:$0xff]  }
 0x36c   :  { %2827 = vmatprep.subr.bf16.mxu1 %v3039_v17  ;;  %2807 = vmatprep.subr.bf16.mxu0 %v3040_v5 }
 0x36d   :  { %v1698_v14 = vmul.f32 %v2603_v41, %v1690_v45  ;;  %v1696_v56 = vmul.f32 %v2603_v41, %v1688_v38  ;;  %v1697_v42 = vmul.f32 %v2603_v41, %v1689_v61  ;;  %2828 = vmatpush3.bf16.msra.mxu1 %v3041_v28  ;;  %2808 = vmatpush3.bf16.msra.mxu0 %v3042_v62  ;;  %v3048_v41 = vld [vmem:[%s4206_s2 + $0x1a0] sm:$0xff]   ;;  %v3049_v45 = vld [vmem:[%s4206_s2 + $0x1a8] sm:$0xff]  }
 0x36e   :  { %2829 = vmatprep.subr.bf16.mxu1 %v3043_v55  ;;  %2858 = vmatprep.subr.bf16.mxu0 %v3069_v60  ;;  %v3050_v61 = vld [vmem:[%s4207_s3] sm:$0xff]  }
 0x36f   :  { %v1706_v46 = vadd.f32 %v2604_v24, %v1698_v14  ;;  %v1704_v15 = vadd.f32 %v2604_v24, %v1696_v56  ;;  %v1705_v6 = vadd.f32 %v2604_v24, %v1697_v42  ;;  %v2606_v14 = vld [vmem:[%s4205_s4 + $0x6] ss:$0 sm:$0xff] }
 0x371   :  { %v1708_v21 = vpack.c.bf16 %v1706_v46, %v1706_v46  ;;  %v1707_v34 = vpack.c.bf16 %v1705_v6, %v1704_v15  ;;  %v2605_v10 = vpack.c.bf16 %v1705_v6, %v1705_v6  ;;  %2830 = vmatpush3.bf16.msra.mxu1 %v3045_v35 }
 0x372   :  { %2870 = vmatprep.subr.bf16.mxu1 %v3069_v60 }
 0x373   :  { %v1718_v30 = vrot.slane %v1707_v34, %v4057_v18  ;;  %v1754_v39 = vrot.slane %v2605_v10, %v4057_v18  ;;  %1784 = vst.msk [vmem:[#allocation3 + $0x4] sm:$0x1] %vm1709_vm7, %v1708_v21  ;;  %1710 = vst.msk [vmem:[#allocation3] sm:$0x1] %vm1709_vm7, %v1707_v34 }
 0x375   :  { %v1719_v58 = vcombine.high %v1718_v30, %v1718_v30  ;;  %v1764_v7 = vcombine.high %v1754_v39, %v1754_v39  ;;  %v1726_v52 = vrot.slane %v1718_v30, %v4057_v18  ;;  %v1761_v63 = vrot.slane %v1754_v39, %v4057_v18 }
 0x377   :  { %v1733_v3 = vrot.slane %v1719_v58, %v4057_v18  ;;  %v1739_v36 = vcombine.high %v1726_v52, %v1726_v52  ;;  %1763 = vst.msk [vmem:[#allocation3 + $0x2] sm:$0x1] %vm1709_vm7, %v1761_v63  ;;  %v1776_v2 = vcombine.high %v1761_v63, %v1761_v63  ;;  %v1771_v11 = vrot.slane %v1764_v7, %v4057_v18 }
 0x379   :  { %1734 = vrot.lane.b32.xlu1 %v1733_v3, %s3066_s9  ;;  %v1742_v23 = vcombine.high %v1733_v3, %v1733_v3  ;;  %1741 = vst.msk [vmem:[#allocation3 + $0x1] sm:$0x1] %vm1709_vm7, %v1739_v36  ;;  %1778 = vst.msk [vmem:[#allocation3 + $0x3] sm:$0x1] %vm1709_vm7, %v1776_v2  ;;  %v1779_v19 = vcombine.high %v1771_v11, %v1771_v11 }
 0x37b   :  { %1743 = vrot.lane.b32.xlu0 %v1742_v23, %s3066_s9 }
 0x37d   :  { %1772 = vrot.lane.b32.xlu1 %v1771_v11, %s3066_s9 }
 0x37f   :  { %1780 = vrot.lane.b32.xlu0 %v1779_v19, %s3066_s9  ;;  %v2644_v19 = vld [vmem:[%s4205_s4 + $0x7] ss:$0 sm:$0xff] }
 0x3eb   :  { %v1735_v1 = vpop.permute.xlu1 %1734 }
 0x3ec   :  { %1738 = vst.msk [vmem:[#allocation3] sm:$0x1] %vm1737_vm8, %v1735_v1  ;;  %v2645_v1 = vld [vmem:[%s4205_s4 + $0x8] ss:$0 sm:$0xff] }
 0x3ed   :  { %v1744_v22 = vpop.permute.xlu0 %1743 }
 0x3ee   :  { %1746 = vst.msk [vmem:[#allocation3 + $0x1] sm:$0x1] %vm1737_vm8, %v1744_v22 }
 0x3ef   :  { %v1773_v49 = vpop.permute.xlu1 %1772 }
 0x3f0   :  { %1775 = vst.msk [vmem:[#allocation3 + $0x2] sm:$0x1] %vm1737_vm8, %v1773_v49 }
 0x3f1   :  { %v1781_v51 = vpop.permute.xlu0 %1780 }
 0x3f2   :  { %1783 = vst.msk [vmem:[#allocation3 + $0x3] sm:$0x1] %vm1737_vm8, %v1781_v51 }
 0x3f9   :  { %v1785_v4 = vld [vmem:[#allocation3] sm:$0x1f] }
 0x3fa   :  { %v1871_v29 = vrot.slane %v1785_v4, %v4057_v18  ;;  %v1864_v33 = vcombine.high %v1785_v4, %v1785_v4  ;;  %v3054_v4 = vld [vmem:[%s4207_s3 + $0x20] sm:$0xff]  }
 0x3fc   :  { %v1879_v31 = vcombine.high %v1871_v29, %v1871_v29  ;;  %v1886_v43 = vrot.slane %v1871_v29, %v4057_v18  ;;  %v1878_v24 = vrot.slane %v1864_v33, %v4057_v18  ;;  %v3055_v29 = vld [vmem:[%s4207_s3 + $0x28] sm:$0xff]  }
 0x3fe   :  { %v1900_v27 = vrot.slane %v1879_v31, %v4057_v18  ;;  %v1901_v37 = vcombine.high %v1886_v43, %v1886_v43  ;;  %v1893_v38 = vrot.slane %v1878_v24, %v4057_v18  ;;  %v2646_v31 = vld [vmem:[%s4205_s4 + $0x9] ss:$0 sm:$0xff] }
 0x400   :  { %2158 = vmatprep.mubr.bf16.mxu0 %v1900_v27  ;;  %v1902_v26 = vcombine.high %v1900_v27, %v1900_v27 }
 0x401   :  { %2159 = vmatmul.mubr.bf16.vlgmr.msra.gmra.mrb[52].mxu0 %v1886_v43 }
 0x402   :  { %2859 = vmatpush3.bf16.msra.mxu0 %v3046_v20  ;;  %2198 = vmatprep.mubr.bf16.mxu1 %v1902_v26 }
 0x403   :  { %2199 = vmatmul.mubr.bf16.vlgmr.msra.gmra.mrb[48].mxu1 %v1901_v37  ;;  %2860 = vmatprep.subr.bf16.mxu0 %v3069_v60 }
 0x404   :  { %2866 = vmatprep.mubr.msk.bf16.mxu0 %vm3070_vm9, %v3069_v60  ;;  %2878 = vmatprep.mubr.msk.bf16.mxu1 %vm3070_vm9, %v3069_v60 }
 0x405   :  { %2871 = vmatpush3.bf16.msra.mxu1 %v3050_v61 }
 0x406   :  { %2861 = vmatpush3.bf16.msra.mxu0 %v3047_v54  ;;  %2872 = vmatprep.subr.bf16.mxu1 %v3069_v60 }
 0x407   :  { %2862 = vmatprep.subr.bf16.mxu0 %v3069_v60 }
 0x409   :  { %2873 = vmatpush3.bf16.msra.mxu1 %v3051_v12 }
 0x40a   :  { %2863 = vmatpush3.bf16.msra.mxu0 %v3048_v41  ;;  %2874 = vmatprep.subr.bf16.mxu1 %v3069_v60 }
 0x40b   :  { %2864 = vmatprep.subr.bf16.mxu0 %v3069_v60 }
 0x40d   :  { %2875 = vmatpush3.bf16.msra.mxu1 %v3052_v8 }
 0x40e   :  { %2865 = vmatpush3.bf16.msra.mxu0 %v3049_v45  ;;  %2876 = vmatprep.subr.bf16.mxu1 %v3069_v60 }
 0x40f   :  { %2882 = vmatprep.subr.bf16.mxu0 %v3069_v60 }
 0x411   :  { %2867 = vmatmul.mubr.msk.bf16.vlgmr.msra.gmra.mrb[56].mxu0 %vm1653_vm5, %v1893_v38  ;;  %2877 = vmatpush3.bf16.msra.mxu1 %v3053_v44 }
 0x412   :  { %2886 = vmatprep.mubr.msk.bf16.mxu0 %vm3070_vm9, %v3069_v60  ;;  %2883 = vmatpush3.bf16.msra.mxu0 %v3054_v4 }
 0x413   :  { %2884 = vmatprep.subr.bf16.mxu0 %v3069_v60 }
 0x416   :  { %2885 = vmatpush3.bf16.msra.mxu0 %v3055_v29 }
 0x4d4   :  { %v2809_v53 = vpop.f32.mrb[52].mxu0 }
 0x4d5   :  { %v2810_v56 = vpop.f32.mrb[53].mxu0 }
 0x4d6   :  { %v2811_v42 = vadd.f32 %v2810_v56, %v2809_v53  ;;  %v2812_v47 = vpop.f32.mrb[54].mxu0  ;;  %v2831_v46 = vpop.f32.mrb[48].mxu1 }
 0x4d7   :  { %v2813_v15 = vpop.f32.mrb[55].mxu0  ;;  %v2832_v6 = vpop.f32.mrb[49].mxu1 }
 0x4d8   :  { %v2161_v18 = vadd.f32 %v2811_v42, %v2606_v14  ;;  %v2833_v57 = vadd.f32 %v2832_v6, %v2831_v46  ;;  %v2834_v50 = vpop.f32.mrb[50].mxu1 }
 0x4d9   :  { %v2835_v13 = vpop.f32.mrb[51].mxu1 }
 0x4da   :  { %v2201_v21 = vadd.f32 %v2833_v57, %v2161_v18  ;;  %v2652_v57 = vld [vmem:[%s4205_s4 + $0xa] ss:$0 sm:$0xff]  ;;  %v2653_v13 = vld [vmem:[%s4205_s4 + $0xb] ss:$0 sm:$0xff] }
 0x4e4   :  { %v2240_v34 = vpop.f32.mrb[56].mxu0 }
 0x4e5   :  { %v2241_v10 = vadd.f32 %v2240_v34, %v2201_v21  ;;  %v2868_v25 = vpop.f32.mrb[57].mxu0 }
 0x4e6   :  { %v2243_v48 = vpop.f32.mrb[58].mxu0  ;;  %v2654_v25 = vld [vmem:[%s4205_s4 + $0xc] ss:$0 sm:$0xff] }
 0x4e7   :  { %v2246_v59 = vmax.f32 %v2241_v10, 0.0  ;;  %v2869_v30 = vpop.f32.mrb[59].mxu0 }
 0x4e9   :  { %v2247_v39 = vsel %vm1657_vm6, %v2246_v59, 0.0 }
 0x4ea   :  { %v2248_v32 = vrot.slane %v2247_v39, 4 }
 0x4ec   :  { %v2249_v40 = vadd.f32 %v2248_v32, %v2247_v39 }
 0x4ee   :  { %v2250_v16 = vrot.slane %v2249_v40, 2 }
 0x4f0   :  { %v2251_v58 = vadd.f32 %v2250_v16, %v2249_v40 }
 0x4f2   :  { %v2252_v7 = vrot.slane %v2251_v58, 1 }
 0x4f4   :  { %v2253_v52 = vadd.f32 %v2252_v7, %v2251_v58 }
 0x4f6   :  { %v2255_v63 = vmul.f32 0.5, %v2253_v52 }
 0x4f8   :  { %v2256_v9 = vsub.f32 %v2246_v59, %v2255_v63 }
 0x4fa   :  { %v2257_v3 = vmul.f32 %v2256_v9, %v2256_v9 }
 0x4fc   :  { %v2258_v36 = vsel %vm1657_vm6, %v2257_v3, 0.0 }
 0x4fd   :  { %v2259_v2 = vrot.slane %v2258_v36, 4 }
 0x4ff   :  { %v2260_v0 = vadd.f32 %v2259_v2, %v2258_v36 }
 0x501   :  { %v2261_v17 = vrot.slane %v2260_v0, 2 }
 0x503   :  { %v2262_v5 = vadd.f32 %v2261_v17, %v2260_v0 }
 0x505   :  { %v2263_v23 = vrot.slane %v2262_v5, 1 }
 0x507   :  { %v2264_v11 = vadd.f32 %v2263_v23, %v2262_v5 }
 0x509   :  { %v2265_v28 = vmul.f32 0.5, %v2264_v11 }
 0x50b   :  { %v2266_v62 = vadd.f32 1e-05, %v2265_v28 }
 0x50d   :  { %3060 = vrsqrt.f32 %v2266_v62 }
 0x517   :  { %v3061_v55 = vpop.eup %3060 }
 0x518   :  { %v2268_v35 = vmul.f32 %v3061_v55, %v2256_v9 }
 0x51a   :  { %v2274_v22 = vmul.f32 %v2644_v19, %v2268_v35 }
 0x51c   :  { %v2280_v49 = vadd.f32 %v2645_v1, %v2274_v22 }
 0x51e   :  { %v2281_v51 = vpack.c.bf16 %v2280_v49, %v2280_v49 }
 0x520   :  { %2879 = vmatmul.mubr.msk.bf16.vlgmr.msra.gmra.mrb[52].mxu1 %vm1653_vm5, %v2281_v51 }
 0x5f3   :  { %v2356_v43 = vpop.f32.mrb[52].mxu1 }
 0x5f4   :  { %v2357_v27 = vadd.f32 %v2646_v31, %v2356_v43  ;;  %v2880_v20 = vpop.f32.mrb[53].mxu1 }
 0x5f5   :  { %v2359_v26 = vpop.f32.mrb[54].mxu1 }
 0x5f6   :  { %v2363_v37 = vsel %vm2362_vm10, %v2357_v27, 0.0  ;;  %v2881_v54 = vpop.f32.mrb[55].mxu1 }
 0x5f7   :  { %v2364_v41 = vrot.slane %v2363_v37, 4 }
 0x5f9   :  { %v2365_v33 = vadd.f32 %v2364_v41, %v2363_v37 }
 0x5fb   :  { %v2366_v45 = vrot.slane %v2365_v33, 2 }
 0x5fd   :  { %v2367_v24 = vadd.f32 %v2366_v45, %v2365_v33 }
 0x5ff   :  { %v2368_v38 = vrot.slane %v2367_v24, 1 }
 0x601   :  { %v2369_v61 = vadd.f32 %v2368_v38, %v2367_v24 }
 0x603   :  { %v2370_v12 = vmul.f32 0.5, %v2369_v61 }
 0x605   :  { %v2371_v60 = vsub.f32 %v2357_v27, %v2370_v12 }
 0x607   :  { %v2372_v8 = vmul.f32 %v2371_v60, %v2371_v60 }
 0x609   :  { %v2373_v44 = vsel %vm2362_vm10, %v2372_v8, 0.0 }
 0x60a   :  { %v2374_v53 = vrot.slane %v2373_v44, 4 }
 0x60c   :  { %v2375_v14 = vadd.f32 %v2374_v53, %v2373_v44 }
 0x60e   :  { %v2376_v56 = vrot.slane %v2375_v14, 2 }
 0x610   :  { %v2377_v42 = vadd.f32 %v2376_v56, %v2375_v14 }
 0x612   :  { %v2378_v47 = vrot.slane %v2377_v42, 1 }
 0x614   :  { %v2379_v46 = vadd.f32 %v2378_v47, %v2377_v42 }
 0x616   :  { %v2380_v15 = vmul.f32 0.5, %v2379_v46 }
 0x618   :  { %v2381_v6 = vadd.f32 1e-05, %v2380_v15 }
 0x61a   :  { %3062 = vrsqrt.f32 %v2381_v6 }
 0x624   :  { %v3063_v18 = vpop.eup %3062 }
 0x625   :  { %v2383_v50 = vmul.f32 %v3063_v18, %v2371_v60 }
 0x627   :  { %v2389_v21 = vmul.f32 %v2652_v57, %v2383_v50 }
 0x629   :  { %v2395_v34 = vadd.f32 %v2653_v13, %v2389_v21 }
 0x62b   :  { %v2396_v10 = vpack.c.bf16 %v2395_v34, %v2395_v34 }
 0x62d   :  { %2887 = vmatmul.mubr.msk.bf16.vlgmr.msra.gmra.mrb[60].mxu0 %vm916_vm2, %v2396_v10 }
 0x700   :  { %v2455_v48 = vpop.f32.mrb[60].mxu0 }
 0x701   :  { %v2456_v59 = vadd.f32 %v2654_v25, %v2455_v48  ;;  %v2888_v30 = vpop.f32.mrb[61].mxu0 }
 0x702   :  { %v2458_v39 = vpop.f32.mrb[62].mxu0 }
 0x703   :  { %2461 = vst [vmem:[%s4208_s6] sm:$0x3] %v2456_v59  ;;  %v2889_v32 = vpop.f32.mrb[63].mxu0 }

</bundles_post_ra>
